<compile_context>
chip_gen: v5e
topology: v5e:2x2
jax: 0.10.0
libtpu: 0.0.40
codegen_flags: <defaults>
</compile_context>

<pallas_src>
import jax
import jax.numpy as jnp
from jax import lax
from jax.experimental import pallas as pl
from jax.experimental.pallas import tpu as pltpu


def _round_up(n, m):
    return ((n + m - 1) // m) * m


def _make_decoder_kernel(seq_len, T_c, Bt, Hp, unroll):
    """Build the kernel closure over static sizes.

    Gate layout along the 4*Hp axis is (i, f, o, g), each block padded to Hp
    (a multiple of 128 lanes), so gate slices are aligned vreg selects.
    """
    needs_mask = (seq_len % T_c) != 0   # last chunk has padded timesteps

    def kernel(x_ref, h0_ref, c0_ref, w_ih_ref, w_hh_ref, b_ref,
               w_lin_ref, b_lin_ref, out_ref,
               xproj_scr, h_scr, c_scr):
        # Grid = (batch_tiles, seq_chunks); seq is the inner (sequential) axis.
        s = pl.program_id(1)
        n_chunks = pl.num_programs(1)

        # ---- Init carried LSTM state at the first chunk of each batch tile. ----
        @pl.when(s == 0)
        def _():
            h_scr[...] = h0_ref[...]
            c_scr[...] = c0_ref[...]

        # ---- Hoisted per-chunk input projection: one bf16 MXU matmul over all
        #      timesteps of the chunk, f32 accumulate, bias folded in. ----
        xproj_scr[...] = (
            jnp.dot(x_ref[0], w_ih_ref[...],
                    preferred_element_type=jnp.float32)
            + b_ref[...]
        )

        w_hh = w_hh_ref[...]   # bf16; stays resident across the recurrence
        # TODO(synk): use pltpu.matmul_push_rhs/matmul_acc_lhs/matmul_pop to keep
        # W_hh in the systolic array across timesteps when Bt << MXU rows.

        # ---- Serial recurrence; h/c carried as loop values (vregs). ----
        def step(t, carry):
            h, c = carry
            off = pl.multiple_of(t * Bt, Bt)          # sublane-aligned row offset
            gates = xproj_scr[pl.ds(off, Bt), :] + jnp.dot(
                h.astype(jnp.bfloat16), w_hh,
                preferred_element_type=jnp.float32)    # (Bt, 4*Hp) f32
            # (i, f, o, g) layout: one contiguous sigmoid + one tanh.
            sig = jax.nn.sigmoid(gates[:, :3 * Hp])
            i_g = sig[:, 0 * Hp:1 * Hp]
            f_g = sig[:, 1 * Hp:2 * Hp]
            o_g = sig[:, 2 * Hp:3 * Hp]
            g_g = jnp.tanh(gates[:, 3 * Hp:])
            c_new = f_g * c + i_g * g_g
            h_new = o_g * jnp.tanh(c_new)
            if needs_mask:
                valid = (s * T_c + t) < seq_len        # skip padded timesteps
                h_new = jnp.where(valid, h_new, h)
                c_new = jnp.where(valid, c_new, c)
            return h_new, c_new

        h_fin, c_fin = lax.fori_loop(0, T_c, step,
                                     (h_scr[...], c_scr[...]),
                                     unroll=unroll)
        h_scr[...] = h_fin
        c_scr[...] = c_fin

        # ---- Final Linear + ReLU on the last hidden state (lane-dense store). ----
        @pl.when(s == n_chunks - 1)
        def _():
            y = (jnp.dot(h_fin.astype(jnp.bfloat16), w_lin_ref[...],
                         preferred_element_type=jnp.float32)
                 + b_lin_ref[...])
            out_ref[...] = jnp.maximum(y, 0.0).astype(out_ref.dtype)

    return kernel


def decoder_forward(x, h0, c0, params):
    """x: (seq, batch, input), h0/c0: (1, batch, hidden). Returns (batch, out)."""
    seq_len, batch, input_size = x.shape
    hidden_size = h0.shape[-1]
    output_size = params["w_lin_t"].shape[-1]

    f32 = jnp.float32
    bf16 = jnp.bfloat16

    # ---- generation-aware VMEM capacity (fallback = v7x's 64 MiB) ----
    try:
        vmem_cap = int(getattr(pltpu.get_tpu_info(),
                               "vmem_capacity_bytes", 64 << 20))
    except Exception:
        vmem_cap = 64 << 20

    # ---- alignment / tiling ----
    n_btiles = 2 if batch >= 16 else 1          # v7x megacore split; no-op else
    Bt = _round_up(-(-batch // n_btiles), 8)    # per-tile batch (sublane aligned)
    Bp = Bt * n_btiles
    Ip = _round_up(input_size, 128)             # lane-aligned input
    Hp = _round_up(hidden_size, 128)            # lane-aligned hidden (per gate)
    Op = _round_up(output_size, 128)            # lane-aligned output

    # Seq chunk size: keep the per-chunk f32 projection scratch within budget.
    xproj_row_bytes = Bt * 4 * Hp * 4
    chunk_budget = (16 << 20) if vmem_cap >= (100 << 20) else (6 << 20)
    T_c = int(max(1, min(seq_len, chunk_budget // xproj_row_bytes)))
    n_chunks = -(-seq_len // T_c)
    seq_pad = n_chunks * T_c

    # ---- activations: bf16 cast, pad only if needed, batch-tile-major layout ----
    x_b = x.astype(bf16)
    if (seq_pad, Bp, Ip) != (seq_len, batch, input_size):
        x_b = jnp.pad(x_b, ((0, seq_pad - seq_len),
                            (0, Bp - batch),
                            (0, Ip - input_size)))
    # (seq_pad, Bp, Ip) -> (n_btiles, seq_pad*Bt, Ip); trivial when n_btiles==1.
    x_r = (x_b.reshape(seq_pad, n_btiles, Bt, Ip)
              .transpose(1, 0, 2, 3)
              .reshape(n_btiles, seq_pad * Bt, Ip))

    h0_p = h0[0].astype(f32)
    c0_p = c0[0].astype(f32)
    if (Bp, Hp) != (batch, hidden_size):
        pad_hw = ((0, Bp - batch), (0, Hp - hidden_size))
        h0_p = jnp.pad(h0_p, pad_hw)
        c0_p = jnp.pad(c0_p, pad_hw)

    # ---- weights: gate blocks reordered (i,f,g,o) -> (i,f,o,g), padded to Hp,
    #      bf16 for everything fed to the MXU, biases kept f32 ----
    def pad_gates(w, rows, rows_p, dtype):
        w4 = w.reshape(rows, 4, hidden_size)[:, (0, 1, 3, 2), :]
        out = jnp.zeros((rows_p, 4, Hp), dtype)
        out = out.at[:rows, :, :hidden_size].set(w4.astype(dtype))
        return out.reshape(rows_p, 4 * Hp)

    w_ih_p = pad_gates(params["w_ih_t"], input_size, Ip, bf16)
    w_hh_p = pad_gates(params["w_hh_t"], hidden_size, Hp, bf16)
    b_p = pad_gates(params["b_gates"], 1, 1, f32)
    w_lin_p = jnp.zeros((Hp, Op), bf16).at[:hidden_size, :output_size].set(
        params["w_lin_t"].astype(bf16))
    b_lin_p = jnp.zeros((1, Op), f32).at[:, :output_size].set(
        params["b_lin"].astype(f32))

    # ---- VMEM budget: double-buffered pipeline inputs + scratch + headroom ----
    in_bytes = 2 * (
        T_c * Bt * Ip * 2            # x chunk (bf16)
        + 2 * Bt * Hp * 4            # h0, c0 blocks (f32)
        + (Ip + Hp) * 4 * Hp * 2     # w_ih, w_hh (bf16)
        + 4 * Hp * 4                 # gate bias (f32)
        + Hp * Op * 2 + Op * 4       # w_lin (bf16), b_lin (f32)
        + Bt * Op * 4                # out block (f32)
    )
    scratch_bytes = T_c * Bt * 4 * Hp * 4 + 2 * Bt * Hp * 4
    vmem_limit = int(min(in_bytes + scratch_bytes + (8 << 20),
                         vmem_cap - (16 << 20)))
    vmem_limit = max(vmem_limit, 16 << 20)

    unroll = True if T_c <= 16 else 8
    kernel = _make_decoder_kernel(seq_len, T_c, Bt, Hp, unroll)

    out_p = pl.pallas_call(
        kernel,
        out_shape=jax.ShapeDtypeStruct((Bp, Op), f32),
        grid_spec=pltpu.PrefetchScalarGridSpec(
            num_scalar_prefetch=0,
            grid=(n_btiles, n_chunks),
            in_specs=[
                pl.BlockSpec((1, T_c * Bt, Ip), lambda b, s: (b, s, 0)),   # x chunk
                pl.BlockSpec((Bt, Hp), lambda b, s: (b, 0)),               # h0
                pl.BlockSpec((Bt, Hp), lambda b, s: (b, 0)),               # c0
                pl.BlockSpec((Ip, 4 * Hp), lambda b, s: (0, 0)),           # W_ih
                pl.BlockSpec((Hp, 4 * Hp), lambda b, s: (0, 0)),           # W_hh
                pl.BlockSpec((1, 4 * Hp), lambda b, s: (0, 0)),            # bias
                pl.BlockSpec((Hp, Op), lambda b, s: (0, 0)),               # W_lin
                pl.BlockSpec((1, Op), lambda b, s: (0, 0)),                # b_lin
            ],
            out_specs=pl.BlockSpec((Bt, Op), lambda b, s: (b, 0)),
            scratch_shapes=[
                pltpu.VMEM((T_c * Bt, 4 * Hp), f32),   # per-chunk input projection
                pltpu.VMEM((Bt, Hp), f32),             # carried h
                pltpu.VMEM((Bt, Hp), f32),             # carried c
            ],
        ),
        compiler_params=pltpu.CompilerParams(
            dimension_semantics=("parallel", "arbitrary"),
            vmem_limit_bytes=vmem_limit,
        ),
    )(x_r, h0_p, c0_p, w_ih_p, w_hh_p, b_p, w_lin_p, b_lin_p)

    return out_p[:batch, :output_size]


def _reference_forward(x, h0, c0, params):
    """Pure-JAX f32 reference matching PyTorch nn.LSTM + Linear + ReLU."""
    H = h0.shape[-1]
    h = h0[0]
    c = c0[0]
    for t in range(x.shape[0]):
        gates = x[t] @ params["w_ih_t"] + h @ params["w_hh_t"] + params["b_gates"]
        i_g = jax.nn.sigmoid(gates[:, 0 * H:1 * H])
        f_g = jax.nn.sigmoid(gates[:, 1 * H:2 * H])
        g_g = jnp.tanh(gates[:, 2 * H:3 * H])
        o_g = jax.nn.sigmoid(gates[:, 3 * H:4 * H])
        c = f_g * c + i_g * g_g
        h = o_g * jnp.tanh(c)
    y = h @ params["w_lin_t"] + params["b_lin"]
    return jnp.maximum(y, 0.0)


def init_params(key, input_size, hidden_size, output_size):
    """Deterministic synthetic params with PyTorch-compatible shapes/layout.

    PyTorch: weight_ih_l0 (4H, in), weight_hh_l0 (4H, H), biases (4H,) each,
    lin.weight (out, H), lin.bias (out,).  Gate order (i, f, g, o).
    We pre-transpose weights and fold the two LSTM biases together.
    """
    ks = jax.random.split(key, 6)
    scale = 0.1
    w_ih = scale * jax.random.normal(ks[0], (4 * hidden_size, input_size), jnp.float32)
    w_hh = scale * jax.random.normal(ks[1], (4 * hidden_size, hidden_size), jnp.float32)
    b_ih = scale * jax.random.normal(ks[2], (4 * hidden_size,), jnp.float32)
    b_hh = scale * jax.random.normal(ks[3], (4 * hidden_size,), jnp.float32)
    w_lin = scale * jax.random.normal(ks[4], (output_size, hidden_size), jnp.float32)
    b_lin = scale * jax.random.normal(ks[5], (output_size,), jnp.float32)
    return {
        "w_ih_t": w_ih.T,                                  # (input, 4H)
        "w_hh_t": w_hh.T,                                  # (H, 4H)
        "b_gates": (b_ih + b_hh).reshape(1, 4 * hidden_size),
        "w_lin_t": w_lin.T,                                # (H, out)
        "b_lin": b_lin.reshape(1, output_size),
    }


if __name__ == "__main__":
    seq_len, batch = 8, 4
    input_size, hidden_size, output_size = 16, 32, 16

    key = jax.random.PRNGKey(0)
    kx, kh, kc, kp = jax.random.split(key, 4)
    x = jax.random.normal(kx, (seq_len, batch, input_size), jnp.float32)
    h0 = jax.random.normal(kh, (1, batch, hidden_size), jnp.float32)
    c0 = jax.random.normal(kc, (1, batch, hidden_size), jnp.float32)
    params = init_params(kp, input_size, hidden_size, output_size)

    fwd = jax.jit(decoder_forward)
    out = fwd(x, h0, c0, params)
    out = jax.block_until_ready(out)

    ref = _reference_forward(x, h0, c0, params)
    assert out.shape == (batch, output_size)
    # bf16 MXU inputs -> loosen tolerance vs. the f32 reference.
    assert jnp.allclose(out, ref, atol=2e-2, rtol=2e-2), "mismatch vs reference"

    print("KERNEL_OK")
</pallas_src>

<mosaic_0001>
module attributes {stable_mosaic.version = 11 : i64} {
  func.func @kernel(%arg0: i32, %arg1: i32, %arg2: memref<1x64x128xbf16, #tpu.memory_space<vmem>>, %arg3: memref<8x128xf32, #tpu.memory_space<vmem>>, %arg4: memref<8x128xf32, #tpu.memory_space<vmem>>, %arg5: memref<128x512xbf16, #tpu.memory_space<vmem>>, %arg6: memref<128x512xbf16, #tpu.memory_space<vmem>>, %arg7: memref<1x512xf32, #tpu.memory_space<vmem>>, %arg8: memref<128x128xbf16, #tpu.memory_space<vmem>>, %arg9: memref<1x128xf32, #tpu.memory_space<vmem>>, %arg10: memref<8x128xf32, #tpu.memory_space<vmem>>, %arg11: memref<64x512xf32, #tpu.memory_space<vmem>>, %arg12: memref<8x128xf32, #tpu.memory_space<vmem>>, %arg13: memref<8x128xf32, #tpu.memory_space<vmem>>) attributes {dimension_semantics = [#tpu.dimension_semantics<parallel>, #tpu.dimension_semantics<arbitrary>], iteration_bounds = array<i64: 1, 1>, scalar_prefetch = 0 : i64, scratch_operands = 3 : i64, tpu.core_type = #tpu.core_type<tc>, window_params = [{transform_indices = @transform_0, window_bounds = array<i64: 1, 64, 128>}, {transform_indices = @transform_1, window_bounds = array<i64: 8, 128>}, {transform_indices = @transform_2, window_bounds = array<i64: 8, 128>}, {pipeline_mode = #tpu.pipeline_mode<synchronous>, transform_indices = @transform_3, window_bounds = array<i64: 128, 512>}, {pipeline_mode = #tpu.pipeline_mode<synchronous>, transform_indices = @transform_4, window_bounds = array<i64: 128, 512>}, {pipeline_mode = #tpu.pipeline_mode<synchronous>, transform_indices = @transform_5, window_bounds = array<i64: 1, 512>}, {pipeline_mode = #tpu.pipeline_mode<synchronous>, transform_indices = @transform_6, window_bounds = array<i64: 128, 128>}, {pipeline_mode = #tpu.pipeline_mode<synchronous>, transform_indices = @transform_7, window_bounds = array<i64: 1, 128>}, {transform_indices = @transform_8, window_bounds = array<i64: 8, 128>}]} {
    %c0_i32 = arith.constant 0 : i32
    %0 = arith.cmpi eq, %arg1, %c0_i32 : i32
    %1 = arith.extui %0 : i1 to i32
    %c0_i32_0 = arith.constant 0 : i32
    %2 = arith.cmpi ne, %1, %c0_i32_0 : i32
    scf.if %2 {
      %c0_54 = arith.constant 0 : index
      %c0_55 = arith.constant 0 : index
      %203 = vector.load %arg3[%c0_54, %c0_55] : memref<8x128xf32, #tpu.memory_space<vmem>>, vector<8x128xf32>
      %c0_56 = arith.constant 0 : index
      %c0_57 = arith.constant 0 : index
      %204 = vector.load %arg12[%c0_56, %c0_57] : memref<8x128xf32, #tpu.memory_space<vmem>>, vector<8x128xf32>
      tpu.vector_store %arg12[%c0_56, %c0_57], %203 {strides = array<i32>} : memref<8x128xf32, #tpu.memory_space<vmem>>, vector<8x128xf32>,
      %c0_58 = arith.constant 0 : index
      %c0_59 = arith.constant 0 : index
      %205 = vector.load %arg4[%c0_58, %c0_59] : memref<8x128xf32, #tpu.memory_space<vmem>>, vector<8x128xf32>
      %c0_60 = arith.constant 0 : index
      %c0_61 = arith.constant 0 : index
      %206 = vector.load %arg13[%c0_60, %c0_61] : memref<8x128xf32, #tpu.memory_space<vmem>>, vector<8x128xf32>
      tpu.vector_store %arg13[%c0_60, %c0_61], %205 {strides = array<i32>} : memref<8x128xf32, #tpu.memory_space<vmem>>, vector<8x128xf32>,
    } else {
    }
    %c0 = arith.constant 0 : index
    %c0_1 = arith.constant 0 : index
    %c0_2 = arith.constant 0 : index
    %3 = vector.load %arg2[%c0, %c0_1, %c0_2] : memref<1x64x128xbf16, #tpu.memory_space<vmem>>, vector<1x64x128xbf16>
    %4 = vector.shape_cast %3 : vector<1x64x128xbf16> to vector<64x128xbf16>
    %c0_3 = arith.constant 0 : index
    %c0_4 = arith.constant 0 : index
    %5 = vector.load %arg5[%c0_3, %c0_4] : memref<128x512xbf16, #tpu.memory_space<vmem>>, vector<128x512xbf16>
    %cst = arith.constant dense<0.000000e+00> : vector<64x512xf32>
    %6 = tpu.matmul %4, %5, %cst {dimension_numbers = #tpu.dot_dimension_numbers<[1], [0], [0], [1], [0, 0, 1, 1], [], []>} : vector<64x128xbf16>, vector<128x512xbf16>, vector<64x512xf32> -> vector<64x512xf32>
    %c0_5 = arith.constant 0 : index
    %c0_6 = arith.constant 0 : index
    %7 = vector.load %arg7[%c0_5, %c0_6] : memref<1x512xf32, #tpu.memory_space<vmem>>, vector<1x512xf32>
    %8 = vector.broadcast %7 : vector<1x512xf32> to vector<64x512xf32>
    %9 = arith.addf %6, %8 : vector<64x512xf32>
    %c0_7 = arith.constant 0 : index
    %c0_8 = arith.constant 0 : index
    %10 = vector.load %arg11[%c0_7, %c0_8] : memref<64x512xf32, #tpu.memory_space<vmem>>, vector<64x512xf32>
    tpu.vector_store %arg11[%c0_7, %c0_8], %9 {strides = array<i32>} : memref<64x512xf32, #tpu.memory_space<vmem>>, vector<64x512xf32>,
    %c0_9 = arith.constant 0 : index
    %c0_10 = arith.constant 0 : index
    %11 = vector.load %arg6[%c0_9, %c0_10] : memref<128x512xbf16, #tpu.memory_space<vmem>>, vector<128x512xbf16>
    %c0_11 = arith.constant 0 : index
    %c0_12 = arith.constant 0 : index
    %12 = vector.load %arg12[%c0_11, %c0_12] : memref<8x128xf32, #tpu.memory_space<vmem>>, vector<8x128xf32>
    %c0_13 = arith.constant 0 : index
    %c0_14 = arith.constant 0 : index
    %13 = vector.load %arg13[%c0_13, %c0_14] : memref<8x128xf32, #tpu.memory_space<vmem>>, vector<8x128xf32>
    %c0_i32_15 = arith.constant 0 : i32
    %c8_i32 = arith.constant 8 : i32
    %14 = arith.muli %c0_i32_15, %c8_i32 : i32
    %15 = tpu.assume_multiple %14, 8 : i32
    %16 = arith.index_cast %15 : i32 to index
    %c0_16 = arith.constant 0 : index
    %17 = vector.load %arg11[%16, %c0_16] : memref<64x512xf32, #tpu.memory_space<vmem>>, vector<8x512xf32>
    %18 = arith.truncf %12 : vector<8x128xf32> to vector<8x128xbf16>
    %cst_17 = arith.constant dense<0.000000e+00> : vector<8x512xf32>
    %19 = tpu.matmul %18, %11, %cst_17 {dimension_numbers = #tpu.dot_dimension_numbers<[1], [0], [0], [1], [0, 0, 1, 1], [], []>} : vector<8x128xbf16>, vector<128x512xbf16>, vector<8x512xf32> -> vector<8x512xf32>
    %20 = arith.addf %17, %19 : vector<8x512xf32>
    %21 = vector.extract_strided_slice %20 {offsets = [0, 0], sizes = [8, 384], strides = [1, 1]} : vector<8x512xf32> to vector<8x384xf32>
    %22 = arith.negf %21 : vector<8x384xf32>
    %23 = math.exp %22 : vector<8x384xf32>
    %cst_18 = arith.constant 1.000000e+00 : f32
    %24 = vector.broadcast %cst_18 : f32 to vector<8x384xf32>
    %25 = arith.addf %24, %23 : vector<8x384xf32>
    %26 = arith.divf %24, %25 : vector<8x384xf32>
    %27 = vector.extract_strided_slice %26 {offsets = [0, 0], sizes = [8, 128], strides = [1, 1]} : vector<8x384xf32> to vector<8x128xf32>
    %28 = vector.extract_strided_slice %26 {offsets = [0, 128], sizes = [8, 128], strides = [1, 1]} : vector<8x384xf32> to vector<8x128xf32>
    %29 = vector.extract_strided_slice %26 {offsets = [0, 256], sizes = [8, 128], strides = [1, 1]} : vector<8x384xf32> to vector<8x128xf32>
    %30 = vector.extract_strided_slice %20 {offsets = [0, 384], sizes = [8, 128], strides = [1, 1]} : vector<8x512xf32> to vector<8x128xf32>
    %31 = math.tanh %30 : vector<8x128xf32>
    %32 = arith.mulf %28, %13 : vector<8x128xf32>
    %33 = arith.mulf %27, %31 : vector<8x128xf32>
    %34 = arith.addf %32, %33 : vector<8x128xf32>
    %35 = math.tanh %34 : vector<8x128xf32>
    %36 = arith.mulf %29, %35 : vector<8x128xf32>
    %c1_i32 = arith.constant 1 : i32
    %c8_i32_19 = arith.constant 8 : i32
    %37 = arith.muli %c1_i32, %c8_i32_19 : i32
    %38 = tpu.assume_multiple %37, 8 : i32
    %39 = arith.index_cast %38 : i32 to index
    %c0_20 = arith.constant 0 : index
    %40 = vector.load %arg11[%39, %c0_20] : memref<64x512xf32, #tpu.memory_space<vmem>>, vector<8x512xf32>
    %41 = arith.truncf %36 : vector<8x128xf32> to vector<8x128xbf16>
    %cst_21 = arith.constant dense<0.000000e+00> : vector<8x512xf32>
    %42 = tpu.matmul %41, %11, %cst_21 {dimension_numbers = #tpu.dot_dimension_numbers<[1], [0], [0], [1], [0, 0, 1, 1], [], []>} : vector<8x128xbf16>, vector<128x512xbf16>, vector<8x512xf32> -> vector<8x512xf32>
    %43 = arith.addf %40, %42 : vector<8x512xf32>
    %44 = vector.extract_strided_slice %43 {offsets = [0, 0], sizes = [8, 384], strides = [1, 1]} : vector<8x512xf32> to vector<8x384xf32>
    %45 = arith.negf %44 : vector<8x384xf32>
    %46 = math.exp %45 : vector<8x384xf32>
    %cst_22 = arith.constant 1.000000e+00 : f32
    %47 = vector.broadcast %cst_22 : f32 to vector<8x384xf32>
    %48 = arith.addf %47, %46 : vector<8x384xf32>
    %49 = arith.divf %47, %48 : vector<8x384xf32>
    %50 = vector.extract_strided_slice %49 {offsets = [0, 0], sizes = [8, 128], strides = [1, 1]} : vector<8x384xf32> to vector<8x128xf32>
    %51 = vector.extract_strided_slice %49 {offsets = [0, 128], sizes = [8, 128], strides = [1, 1]} : vector<8x384xf32> to vector<8x128xf32>
    %52 = vector.extract_strided_slice %49 {offsets = [0, 256], sizes = [8, 128], strides = [1, 1]} : vector<8x384xf32> to vector<8x128xf32>
    %53 = vector.extract_strided_slice %43 {offsets = [0, 384], sizes = [8, 128], strides = [1, 1]} : vector<8x512xf32> to vector<8x128xf32>
    %54 = math.tanh %53 : vector<8x128xf32>
    %55 = arith.mulf %51, %34 : vector<8x128xf32>
    %56 = arith.mulf %50, %54 : vector<8x128xf32>
    %57 = arith.addf %55, %56 : vector<8x128xf32>
    %58 = math.tanh %57 : vector<8x128xf32>
    %59 = arith.mulf %52, %58 : vector<8x128xf32>
    %c2_i32 = arith.constant 2 : i32
    %c8_i32_23 = arith.constant 8 : i32
    %60 = arith.muli %c2_i32, %c8_i32_23 : i32
    %61 = tpu.assume_multiple %60, 8 : i32
    %62 = arith.index_cast %61 : i32 to index
    %c0_24 = arith.constant 0 : index
    %63 = vector.load %arg11[%62, %c0_24] : memref<64x512xf32, #tpu.memory_space<vmem>>, vector<8x512xf32>
    %64 = arith.truncf %59 : vector<8x128xf32> to vector<8x128xbf16>
    %cst_25 = arith.constant dense<0.000000e+00> : vector<8x512xf32>
    %65 = tpu.matmul %64, %11, %cst_25 {dimension_numbers = #tpu.dot_dimension_numbers<[1], [0], [0], [1], [0, 0, 1, 1], [], []>} : vector<8x128xbf16>, vector<128x512xbf16>, vector<8x512xf32> -> vector<8x512xf32>
    %66 = arith.addf %63, %65 : vector<8x512xf32>
    %67 = vector.extract_strided_slice %66 {offsets = [0, 0], sizes = [8, 384], strides = [1, 1]} : vector<8x512xf32> to vector<8x384xf32>
    %68 = arith.negf %67 : vector<8x384xf32>
    %69 = math.exp %68 : vector<8x384xf32>
    %cst_26 = arith.constant 1.000000e+00 : f32
    %70 = vector.broadcast %cst_26 : f32 to vector<8x384xf32>
    %71 = arith.addf %70, %69 : vector<8x384xf32>
    %72 = arith.divf %70, %71 : vector<8x384xf32>
    %73 = vector.extract_strided_slice %72 {offsets = [0, 0], sizes = [8, 128], strides = [1, 1]} : vector<8x384xf32> to vector<8x128xf32>
    %74 = vector.extract_strided_slice %72 {offsets = [0, 128], sizes = [8, 128], strides = [1, 1]} : vector<8x384xf32> to vector<8x128xf32>
    %75 = vector.extract_strided_slice %72 {offsets = [0, 256], sizes = [8, 128], strides = [1, 1]} : vector<8x384xf32> to vector<8x128xf32>
    %76 = vector.extract_strided_slice %66 {offsets = [0, 384], sizes = [8, 128], strides = [1, 1]} : vector<8x512xf32> to vector<8x128xf32>
    %77 = math.tanh %76 : vector<8x128xf32>
    %78 = arith.mulf %74, %57 : vector<8x128xf32>
    %79 = arith.mulf %73, %77 : vector<8x128xf32>
    %80 = arith.addf %78, %79 : vector<8x128xf32>
    %81 = math.tanh %80 : vector<8x128xf32>
    %82 = arith.mulf %75, %81 : vector<8x128xf32>
    %c3_i32 = arith.constant 3 : i32
    %c8_i32_27 = arith.constant 8 : i32
    %83 = arith.muli %c3_i32, %c8_i32_27 : i32
    %84 = tpu.assume_multiple %83, 8 : i32
    %85 = arith.index_cast %84 : i32 to index
    %c0_28 = arith.constant 0 : index
    %86 = vector.load %arg11[%85, %c0_28] : memref<64x512xf32, #tpu.memory_space<vmem>>, vector<8x512xf32>
    %87 = arith.truncf %82 : vector<8x128xf32> to vector<8x128xbf16>
    %cst_29 = arith.constant dense<0.000000e+00> : vector<8x512xf32>
    %88 = tpu.matmul %87, %11, %cst_29 {dimension_numbers = #tpu.dot_dimension_numbers<[1], [0], [0], [1], [0, 0, 1, 1], [], []>} : vector<8x128xbf16>, vector<128x512xbf16>, vector<8x512xf32> -> vector<8x512xf32>
    %89 = arith.addf %86, %88 : vector<8x512xf32>
    %90 = vector.extract_strided_slice %89 {offsets = [0, 0], sizes = [8, 384], strides = [1, 1]} : vector<8x512xf32> to vector<8x384xf32>
    %91 = arith.negf %90 : vector<8x384xf32>
    %92 = math.exp %91 : vector<8x384xf32>
    %cst_30 = arith.constant 1.000000e+00 : f32
    %93 = vector.broadcast %cst_30 : f32 to vector<8x384xf32>
    %94 = arith.addf %93, %92 : vector<8x384xf32>
    %95 = arith.divf %93, %94 : vector<8x384xf32>
    %96 = vector.extract_strided_slice %95 {offsets = [0, 0], sizes = [8, 128], strides = [1, 1]} : vector<8x384xf32> to vector<8x128xf32>
    %97 = vector.extract_strided_slice %95 {offsets = [0, 128], sizes = [8, 128], strides = [1, 1]} : vector<8x384xf32> to vector<8x128xf32>
    %98 = vector.extract_strided_slice %95 {offsets = [0, 256], sizes = [8, 128], strides = [1, 1]} : vector<8x384xf32> to vector<8x128xf32>
    %99 = vector.extract_strided_slice %89 {offsets = [0, 384], sizes = [8, 128], strides = [1, 1]} : vector<8x512xf32> to vector<8x128xf32>
    %100 = math.tanh %99 : vector<8x128xf32>
    %101 = arith.mulf %97, %80 : vector<8x128xf32>
    %102 = arith.mulf %96, %100 : vector<8x128xf32>
    %103 = arith.addf %101, %102 : vector<8x128xf32>
    %104 = math.tanh %103 : vector<8x128xf32>
    %105 = arith.mulf %98, %104 : vector<8x128xf32>
    %c4_i32 = arith.constant 4 : i32
    %c8_i32_31 = arith.constant 8 : i32
    %106 = arith.muli %c4_i32, %c8_i32_31 : i32
    %107 = tpu.assume_multiple %106, 8 : i32
    %108 = arith.index_cast %107 : i32 to index
    %c0_32 = arith.constant 0 : index
    %109 = vector.load %arg11[%108, %c0_32] : memref<64x512xf32, #tpu.memory_space<vmem>>, vector<8x512xf32>
    %110 = arith.truncf %105 : vector<8x128xf32> to vector<8x128xbf16>
    %cst_33 = arith.constant dense<0.000000e+00> : vector<8x512xf32>
    %111 = tpu.matmul %110, %11, %cst_33 {dimension_numbers = #tpu.dot_dimension_numbers<[1], [0], [0], [1], [0, 0, 1, 1], [], []>} : vector<8x128xbf16>, vector<128x512xbf16>, vector<8x512xf32> -> vector<8x512xf32>
    %112 = arith.addf %109, %111 : vector<8x512xf32>
    %113 = vector.extract_strided_slice %112 {offsets = [0, 0], sizes = [8, 384], strides = [1, 1]} : vector<8x512xf32> to vector<8x384xf32>
    %114 = arith.negf %113 : vector<8x384xf32>
    %115 = math.exp %114 : vector<8x384xf32>
    %cst_34 = arith.constant 1.000000e+00 : f32
    %116 = vector.broadcast %cst_34 : f32 to vector<8x384xf32>
    %117 = arith.addf %116, %115 : vector<8x384xf32>
    %118 = arith.divf %116, %117 : vector<8x384xf32>
    %119 = vector.extract_strided_slice %118 {offsets = [0, 0], sizes = [8, 128], strides = [1, 1]} : vector<8x384xf32> to vector<8x128xf32>
    %120 = vector.extract_strided_slice %118 {offsets = [0, 128], sizes = [8, 128], strides = [1, 1]} : vector<8x384xf32> to vector<8x128xf32>
    %121 = vector.extract_strided_slice %118 {offsets = [0, 256], sizes = [8, 128], strides = [1, 1]} : vector<8x384xf32> to vector<8x128xf32>
    %122 = vector.extract_strided_slice %112 {offsets = [0, 384], sizes = [8, 128], strides = [1, 1]} : vector<8x512xf32> to vector<8x128xf32>
    %123 = math.tanh %122 : vector<8x128xf32>
    %124 = arith.mulf %120, %103 : vector<8x128xf32>
    %125 = arith.mulf %119, %123 : vector<8x128xf32>
    %126 = arith.addf %124, %125 : vector<8x128xf32>
    %127 = math.tanh %126 : vector<8x128xf32>
    %128 = arith.mulf %121, %127 : vector<8x128xf32>
    %c5_i32 = arith.constant 5 : i32
    %c8_i32_35 = arith.constant 8 : i32
    %129 = arith.muli %c5_i32, %c8_i32_35 : i32
    %130 = tpu.assume_multiple %129, 8 : i32
    %131 = arith.index_cast %130 : i32 to index
    %c0_36 = arith.constant 0 : index
    %132 = vector.load %arg11[%131, %c0_36] : memref<64x512xf32, #tpu.memory_space<vmem>>, vector<8x512xf32>
    %133 = arith.truncf %128 : vector<8x128xf32> to vector<8x128xbf16>
    %cst_37 = arith.constant dense<0.000000e+00> : vector<8x512xf32>
    %134 = tpu.matmul %133, %11, %cst_37 {dimension_numbers = #tpu.dot_dimension_numbers<[1], [0], [0], [1], [0, 0, 1, 1], [], []>} : vector<8x128xbf16>, vector<128x512xbf16>, vector<8x512xf32> -> vector<8x512xf32>
    %135 = arith.addf %132, %134 : vector<8x512xf32>
    %136 = vector.extract_strided_slice %135 {offsets = [0, 0], sizes = [8, 384], strides = [1, 1]} : vector<8x512xf32> to vector<8x384xf32>
    %137 = arith.negf %136 : vector<8x384xf32>
    %138 = math.exp %137 : vector<8x384xf32>
    %cst_38 = arith.constant 1.000000e+00 : f32
    %139 = vector.broadcast %cst_38 : f32 to vector<8x384xf32>
    %140 = arith.addf %139, %138 : vector<8x384xf32>
    %141 = arith.divf %139, %140 : vector<8x384xf32>
    %142 = vector.extract_strided_slice %141 {offsets = [0, 0], sizes = [8, 128], strides = [1, 1]} : vector<8x384xf32> to vector<8x128xf32>
    %143 = vector.extract_strided_slice %141 {offsets = [0, 128], sizes = [8, 128], strides = [1, 1]} : vector<8x384xf32> to vector<8x128xf32>
    %144 = vector.extract_strided_slice %141 {offsets = [0, 256], sizes = [8, 128], strides = [1, 1]} : vector<8x384xf32> to vector<8x128xf32>
    %145 = vector.extract_strided_slice %135 {offsets = [0, 384], sizes = [8, 128], strides = [1, 1]} : vector<8x512xf32> to vector<8x128xf32>
    %146 = math.tanh %145 : vector<8x128xf32>
    %147 = arith.mulf %143, %126 : vector<8x128xf32>
    %148 = arith.mulf %142, %146 : vector<8x128xf32>
    %149 = arith.addf %147, %148 : vector<8x128xf32>
    %150 = math.tanh %149 : vector<8x128xf32>
    %151 = arith.mulf %144, %150 : vector<8x128xf32>
    %c6_i32 = arith.constant 6 : i32
    %c8_i32_39 = arith.constant 8 : i32
    %152 = arith.muli %c6_i32, %c8_i32_39 : i32
    %153 = tpu.assume_multiple %152, 8 : i32
    %154 = arith.index_cast %153 : i32 to index
    %c0_40 = arith.constant 0 : index
    %155 = vector.load %arg11[%154, %c0_40] : memref<64x512xf32, #tpu.memory_space<vmem>>, vector<8x512xf32>
    %156 = arith.truncf %151 : vector<8x128xf32> to vector<8x128xbf16>
    %cst_41 = arith.constant dense<0.000000e+00> : vector<8x512xf32>
    %157 = tpu.matmul %156, %11, %cst_41 {dimension_numbers = #tpu.dot_dimension_numbers<[1], [0], [0], [1], [0, 0, 1, 1], [], []>} : vector<8x128xbf16>, vector<128x512xbf16>, vector<8x512xf32> -> vector<8x512xf32>
    %158 = arith.addf %155, %157 : vector<8x512xf32>
    %159 = vector.extract_strided_slice %158 {offsets = [0, 0], sizes = [8, 384], strides = [1, 1]} : vector<8x512xf32> to vector<8x384xf32>
    %160 = arith.negf %159 : vector<8x384xf32>
    %161 = math.exp %160 : vector<8x384xf32>
    %cst_42 = arith.constant 1.000000e+00 : f32
    %162 = vector.broadcast %cst_42 : f32 to vector<8x384xf32>
    %163 = arith.addf %162, %161 : vector<8x384xf32>
    %164 = arith.divf %162, %163 : vector<8x384xf32>
    %165 = vector.extract_strided_slice %164 {offsets = [0, 0], sizes = [8, 128], strides = [1, 1]} : vector<8x384xf32> to vector<8x128xf32>
    %166 = vector.extract_strided_slice %164 {offsets = [0, 128], sizes = [8, 128], strides = [1, 1]} : vector<8x384xf32> to vector<8x128xf32>
    %167 = vector.extract_strided_slice %164 {offsets = [0, 256], sizes = [8, 128], strides = [1, 1]} : vector<8x384xf32> to vector<8x128xf32>
    %168 = vector.extract_strided_slice %158 {offsets = [0, 384], sizes = [8, 128], strides = [1, 1]} : vector<8x512xf32> to vector<8x128xf32>
    %169 = math.tanh %168 : vector<8x128xf32>
    %170 = arith.mulf %166, %149 : vector<8x128xf32>
    %171 = arith.mulf %165, %169 : vector<8x128xf32>
    %172 = arith.addf %170, %171 : vector<8x128xf32>
    %173 = math.tanh %172 : vector<8x128xf32>
    %174 = arith.mulf %167, %173 : vector<8x128xf32>
    %c7_i32 = arith.constant 7 : i32
    %c8_i32_43 = arith.constant 8 : i32
    %175 = arith.muli %c7_i32, %c8_i32_43 : i32
    %176 = tpu.assume_multiple %175, 8 : i32
    %177 = arith.index_cast %176 : i32 to index
    %c0_44 = arith.constant 0 : index
    %178 = vector.load %arg11[%177, %c0_44] : memref<64x512xf32, #tpu.memory_space<vmem>>, vector<8x512xf32>
    %179 = arith.truncf %174 : vector<8x128xf32> to vector<8x128xbf16>
    %cst_45 = arith.constant dense<0.000000e+00> : vector<8x512xf32>
    %180 = tpu.matmul %179, %11, %cst_45 {dimension_numbers = #tpu.dot_dimension_numbers<[1], [0], [0], [1], [0, 0, 1, 1], [], []>} : vector<8x128xbf16>, vector<128x512xbf16>, vector<8x512xf32> -> vector<8x512xf32>
    %181 = arith.addf %178, %180 : vector<8x512xf32>
    %182 = vector.extract_strided_slice %181 {offsets = [0, 0], sizes = [8, 384], strides = [1, 1]} : vector<8x512xf32> to vector<8x384xf32>
    %183 = arith.negf %182 : vector<8x384xf32>
    %184 = math.exp %183 : vector<8x384xf32>
    %cst_46 = arith.constant 1.000000e+00 : f32
    %185 = vector.broadcast %cst_46 : f32 to vector<8x384xf32>
    %186 = arith.addf %185, %184 : vector<8x384xf32>
    %187 = arith.divf %185, %186 : vector<8x384xf32>
    %188 = vector.extract_strided_slice %187 {offsets = [0, 0], sizes = [8, 128], strides = [1, 1]} : vector<8x384xf32> to vector<8x128xf32>
    %189 = vector.extract_strided_slice %187 {offsets = [0, 128], sizes = [8, 128], strides = [1, 1]} : vector<8x384xf32> to vector<8x128xf32>
    %190 = vector.extract_strided_slice %187 {offsets = [0, 256], sizes = [8, 128], strides = [1, 1]} : vector<8x384xf32> to vector<8x128xf32>
    %191 = vector.extract_strided_slice %181 {offsets = [0, 384], sizes = [8, 128], strides = [1, 1]} : vector<8x512xf32> to vector<8x128xf32>
    %192 = math.tanh %191 : vector<8x128xf32>
    %193 = arith.mulf %189, %172 : vector<8x128xf32>
    %194 = arith.mulf %188, %192 : vector<8x128xf32>
    %195 = arith.addf %193, %194 : vector<8x128xf32>
    %196 = math.tanh %195 : vector<8x128xf32>
    %197 = arith.mulf %190, %196 : vector<8x128xf32>
    %c8_i32_47 = arith.constant 8 : i32
    %c0_48 = arith.constant 0 : index
    %c0_49 = arith.constant 0 : index
    %198 = vector.load %arg12[%c0_48, %c0_49] : memref<8x128xf32, #tpu.memory_space<vmem>>, vector<8x128xf32>
    tpu.vector_store %arg12[%c0_48, %c0_49], %197 {strides = array<i32>} : memref<8x128xf32, #tpu.memory_space<vmem>>, vector<8x128xf32>,
    %c0_50 = arith.constant 0 : index
    %c0_51 = arith.constant 0 : index
    %199 = vector.load %arg13[%c0_50, %c0_51] : memref<8x128xf32, #tpu.memory_space<vmem>>, vector<8x128xf32>
    tpu.vector_store %arg13[%c0_50, %c0_51], %195 {strides = array<i32>} : memref<8x128xf32, #tpu.memory_space<vmem>>, vector<8x128xf32>,
    %c0_i32_52 = arith.constant 0 : i32
    %200 = arith.cmpi eq, %arg1, %c0_i32_52 : i32
    %201 = arith.extui %200 : i1 to i32
    %c0_i32_53 = arith.constant 0 : i32
    %202 = arith.cmpi ne, %201, %c0_i32_53 : i32
    scf.if %202 {
      %203 = arith.truncf %197 : vector<8x128xf32> to vector<8x128xbf16>
      %c0_54 = arith.constant 0 : index
      %c0_55 = arith.constant 0 : index
      %204 = vector.load %arg8[%c0_54, %c0_55] : memref<128x128xbf16, #tpu.memory_space<vmem>>, vector<128x128xbf16>
      %cst_56 = arith.constant dense<0.000000e+00> : vector<8x128xf32>
      %205 = tpu.matmul %203, %204, %cst_56 {dimension_numbers = #tpu.dot_dimension_numbers<[1], [0], [0], [1], [0, 0, 1, 1], [], []>} : vector<8x128xbf16>, vector<128x128xbf16>, vector<8x128xf32> -> vector<8x128xf32>
      %c0_57 = arith.constant 0 : index
      %c0_58 = arith.constant 0 : index
      %206 = vector.load %arg9[%c0_57, %c0_58] : memref<1x128xf32, #tpu.memory_space<vmem>>, vector<1x128xf32>
      %207 = vector.broadcast %206 : vector<1x128xf32> to vector<8x128xf32>
      %208 = arith.addf %205, %207 : vector<8x128xf32>
      %cst_59 = arith.constant 0.000000e+00 : f32
      %209 = vector.broadcast %cst_59 : f32 to vector<8x128xf32>
      %210 = arith.maximumf %208, %209 : vector<8x128xf32>
      %c0_60 = arith.constant 0 : index
      %c0_61 = arith.constant 0 : index
      %211 = vector.load %arg10[%c0_60, %c0_61] : memref<8x128xf32, #tpu.memory_space<vmem>>, vector<8x128xf32>
      tpu.vector_store %arg10[%c0_60, %c0_61], %210 {strides = array<i32>} : memref<8x128xf32, #tpu.memory_space<vmem>>, vector<8x128xf32>,
    } else {
    }
    return
  }
  func.func @transform_0(%arg0: i32, %arg1: i32) -> (i32, i32, i32) {
    %c0_i32 = arith.constant 0 : i32
    %c0_i32_0 = arith.constant 0 : i32
    return %arg0, %arg1, %c0_i32 : i32, i32, i32
  }
  func.func @transform_1(%arg0: i32, %arg1: i32) -> (i32, i32) {
    %c0_i32 = arith.constant 0 : i32
    %c0_i32_0 = arith.constant 0 : i32
    return %arg0, %c0_i32 : i32, i32
  }
  func.func @transform_2(%arg0: i32, %arg1: i32) -> (i32, i32) {
    %c0_i32 = arith.constant 0 : i32
    %c0_i32_0 = arith.constant 0 : i32
    return %arg0, %c0_i32 : i32, i32
  }
  func.func @transform_3(%arg0: i32, %arg1: i32) -> (i32, i32) {
    %c0_i32 = arith.constant 0 : i32
    %c0_i32_0 = arith.constant 0 : i32
    %c0_i32_1 = arith.constant 0 : i32
    return %c0_i32, %c0_i32_0 : i32, i32
  }
  func.func @transform_4(%arg0: i32, %arg1: i32) -> (i32, i32) {
    %c0_i32 = arith.constant 0 : i32
    %c0_i32_0 = arith.constant 0 : i32
    %c0_i32_1 = arith.constant 0 : i32
    return %c0_i32, %c0_i32_0 : i32, i32
  }
  func.func @transform_5(%arg0: i32, %arg1: i32) -> (i32, i32) {
    %c0_i32 = arith.constant 0 : i32
    %c0_i32_0 = arith.constant 0 : i32
    %c0_i32_1 = arith.constant 0 : i32
    return %c0_i32, %c0_i32_0 : i32, i32
  }
  func.func @transform_6(%arg0: i32, %arg1: i32) -> (i32, i32) {
    %c0_i32 = arith.constant 0 : i32
    %c0_i32_0 = arith.constant 0 : i32
    %c0_i32_1 = arith.constant 0 : i32
    return %c0_i32, %c0_i32_0 : i32, i32
  }
  func.func @transform_7(%arg0: i32, %arg1: i32) -> (i32, i32) {
    %c0_i32 = arith.constant 0 : i32
    %c0_i32_0 = arith.constant 0 : i32
    %c0_i32_1 = arith.constant 0 : i32
    return %c0_i32, %c0_i32_0 : i32, i32
  }
  func.func @transform_8(%arg0: i32, %arg1: i32) -> (i32, i32) {
    %c0_i32 = arith.constant 0 : i32
    %c0_i32_0 = arith.constant 0 : i32
    return %arg0, %c0_i32 : i32, i32
  }
}

</mosaic_0001>

<bundles_post_ra>
// kernel: decoder_forward.1
= control target key start
LH: loop header
LB: loop body
LE: loop exit
PB: predicated region body
PF: predicated region fallthrough
CT: control target
= control target key end

     0   :  { %s3210_s3 = inlined_call_operand.vmem [shape: bf16[128,512], index: 3, kind: input, shape index: {}]   ;;  %s3211_s4 = inlined_call_operand.vmem [shape: bf16[128,512], index: 4, kind: input, shape index: {}]   ;;  %s3212_s0 = inlined_call_operand.vmem [shape: bf16[1,64,128], index: 0, kind: input, shape index: {}]   ;;  %s3213_s1 = inlined_call_operand.vmem [shape: f32[8,128], index: 1, kind: input, shape index: {}]   ;;  %s3214_s5 = inlined_call_operand.vmem [shape: f32[1,512], index: 5, kind: input, shape index: {}]   ;;  %s3215_s2 = inlined_call_operand.vmem [shape: f32[8,128], index: 2, kind: input, shape index: {}]   ;;  %s3216_s7 = inlined_call_operand.vmem [shape: f32[1,128], index: 7, kind: input, shape index: {}]   ;;  %s3217_s6 = inlined_call_operand.vmem [shape: bf16[128,128], index: 6, kind: input, shape index: {}]   ;;  %s3218_s8 = inlined_call_operand.vmem [shape: f32[8,128], index: 8, kind: output, shape index: {}]  }
   0x1   :  { %v1859_v0 = vld [vmem:[%s3210_s3 + $0xe0] sm:$0xf]  ;;  %v2091_v1 = vld [vmem:[%s3210_s3 + $0xec] sm:$0xf0]  ;;  %v2089_v2 = vld [vmem:[%s3210_s3 + $0xe4] sm:$0xf] }
   0x2   :  { %v1860_v3 = vor.u32 %v2091_v1, %v1859_v0  ;;  %v1861_v4 = vld [vmem:[%s3210_s3 + $0xf0] sm:$0xf0]  ;;  %v1867_v5 = vld [vmem:[%s3210_s3 + $0xe8] sm:$0xf]  ;;  %v2092_v6 = vld [vmem:[%s3210_s3 + $0xf4] sm:$0xf0] }
   0x3   :  { %v1864_v7 = vor.u32 %v2089_v2, %v1861_v4  ;;  %v1868_v8 = vor.u32 %v2092_v6, %v1867_v5  ;;  %v2090_v9 = vld [vmem:[%s3210_s3 + $0xec] sm:$0xf]  ;;  %v1869_v10 = vld [vmem:[%s3210_s3 + $0xf8] sm:$0xf0]  ;;  %v1843_v11 = vld [vmem:[%s3210_s3 + $0xc0] sm:$0xf] }
   0x4   :  { %271 = vmatpush.bf16.msra.mxu0 %v1860_v3  ;;  %v1872_v12 = vor.u32 %v2090_v9, %v1869_v10  ;;  %v2087_v13 = vld [vmem:[%s3210_s3 + $0xcc] sm:$0xf0]  ;;  %v2085_v14 = vld [vmem:[%s3210_s3 + $0xc4] sm:$0xf]  ;;  %v1845_v15 = vld [vmem:[%s3210_s3 + $0xd0] sm:$0xf0] }
   0x5   :  { %300 = vmatpush.bf16.msra.mxu1 %v1864_v7  ;;  %329 = vmatpush.bf16.msra.mxu2 %v1868_v8  ;;  %v1844_v16 = vor.u32 %v2087_v13, %v1843_v11  ;;  %v1848_v17 = vor.u32 %v2085_v14, %v1845_v15  ;;  %v1851_v18 = vld [vmem:[%s3210_s3 + $0xc8] sm:$0xf]  ;;  %v2088_v19 = vld [vmem:[%s3210_s3 + $0xd4] sm:$0xf0]  ;;  %v2086_v20 = vld [vmem:[%s3210_s3 + $0xcc] sm:$0xf] }
   0x6   :  { %358 = vmatpush.bf16.msra.mxu3 %v1872_v12  ;;  %v1852_v21 = vor.u32 %v2088_v19, %v1851_v18  ;;  %v1853_v22 = vld [vmem:[%s3210_s3 + $0xd8] sm:$0xf0]  ;;  %v1827_v23 = vld [vmem:[%s3210_s3 + $0xa0] sm:$0xf]  ;;  %v2083_v24 = vld [vmem:[%s3210_s3 + $0xac] sm:$0xf0] }
   0x7   :  { %v1856_v25 = vor.u32 %v2086_v20, %v1853_v22  ;;  %v2081_v26 = vld [vmem:[%s3210_s3 + $0xa4] sm:$0xf]  ;;  %v1829_v27 = vld [vmem:[%s3210_s3 + $0xb0] sm:$0xf0]  ;;  %v1835_v28 = vld [vmem:[%s3210_s3 + $0xa8] sm:$0xf]  ;;  %v1828_v29 = vor.u32 %v2083_v24, %v1827_v23 }
   0x8   :  { %272 = vmatpush.bf16.msra.mxu0 %v1844_v16  ;;  %v2084_v30 = vld [vmem:[%s3210_s3 + $0xb4] sm:$0xf0]  ;;  %v2082_v31 = vld [vmem:[%s3210_s3 + $0xac] sm:$0xf]  ;;  %v1837_v32 = vld [vmem:[%s3210_s3 + $0xb8] sm:$0xf0]  ;;  %v1832_v33 = vor.u32 %v2081_v26, %v1829_v27 }
   0x9   :  { %301 = vmatpush.bf16.msra.mxu1 %v1848_v17  ;;  %330 = vmatpush.bf16.msra.mxu2 %v1852_v21  ;;  %v1836_v34 = vor.u32 %v2084_v30, %v1835_v28  ;;  %v1811_v35 = vld [vmem:[%s3210_s3 + $0x80] sm:$0xf]  ;;  %v2079_v36 = vld [vmem:[%s3210_s3 + $0x8c] sm:$0xf0]  ;;  %v2077_v37 = vld [vmem:[%s3210_s3 + $0x84] sm:$0xf]  ;;  %v1840_v38 = vor.u32 %v2082_v31, %v1837_v32 }
   0xa   :  { %359 = vmatpush.bf16.msra.mxu3 %v1856_v25  ;;  %v1813_v39 = vld [vmem:[%s3210_s3 + $0x90] sm:$0xf0]  ;;  %v1819_v40 = vld [vmem:[%s3210_s3 + $0x88] sm:$0xf]  ;;  %v2080_v41 = vld [vmem:[%s3210_s3 + $0x94] sm:$0xf0]  ;;  %v1812_v44 = vor.u32 %v2079_v36, %v1811_v35 }
   0xb   :  { %v2078_v42 = vld [vmem:[%s3210_s3 + $0x8c] sm:$0xf]  ;;  %v1821_v43 = vld [vmem:[%s3210_s3 + $0x98] sm:$0xf0]  ;;  %v1816_v45 = vor.u32 %v2077_v37, %v1813_v39  ;;  %v1820_v46 = vor.u32 %v2080_v41, %v1819_v40  ;;  %v1795_v47 = vld [vmem:[%s3210_s3 + $0x60] sm:$0xf] }
   0xc   :  { %273 = vmatpush.bf16.msra.mxu0 %v1828_v29  ;;  %v2075_v48 = vld [vmem:[%s3210_s3 + $0x6c] sm:$0xf0]  ;;  %v2073_v49 = vld [vmem:[%s3210_s3 + $0x64] sm:$0xf]  ;;  %v1824_v50 = vor.u32 %v2078_v42, %v1821_v43  ;;  %v1797_v51 = vld [vmem:[%s3210_s3 + $0x70] sm:$0xf0] }
   0xd   :  { %302 = vmatpush.bf16.msra.mxu1 %v1832_v33  ;;  %331 = vmatpush.bf16.msra.mxu2 %v1836_v34  ;;  %v1803_v52 = vld [vmem:[%s3210_s3 + $0x68] sm:$0xf]  ;;  %v2076_v53 = vld [vmem:[%s3210_s3 + $0x74] sm:$0xf0]  ;;  %v2074_v54 = vld [vmem:[%s3210_s3 + $0x6c] sm:$0xf]  ;;  %v1796_v56 = vor.u32 %v2075_v48, %v1795_v47  ;;  %v1800_v57 = vor.u32 %v2073_v49, %v1797_v51 }
   0xe   :  { %360 = vmatpush.bf16.msra.mxu3 %v1840_v38  ;;  %v1805_v55 = vld [vmem:[%s3210_s3 + $0x78] sm:$0xf0]  ;;  %v1804_v58 = vor.u32 %v2076_v53, %v1803_v52  ;;  %v1779_v59 = vld [vmem:[%s3210_s3 + $0x40] sm:$0xf]  ;;  %v2071_v60 = vld [vmem:[%s3210_s3 + $0x4c] sm:$0xf0] }
   0xf   :  { %v2069_v61 = vld [vmem:[%s3210_s3 + $0x44] sm:$0xf]  ;;  %v1808_v62 = vor.u32 %v2074_v54, %v1805_v55  ;;  %v1781_v63 = vld [vmem:[%s3210_s3 + $0x50] sm:$0xf0]  ;;  %v1787_v0 = vld [vmem:[%s3210_s3 + $0x48] sm:$0xf]  ;;  %v1780_v4 = vor.u32 %v2071_v60, %v1779_v59 }
  0x10   :  { %274 = vmatpush.bf16.msra.mxu0 %v1812_v44  ;;  %v2072_v1 = vld [vmem:[%s3210_s3 + $0x54] sm:$0xf0]  ;;  %v2070_v2 = vld [vmem:[%s3210_s3 + $0x4c] sm:$0xf]  ;;  %v1789_v3 = vld [vmem:[%s3210_s3 + $0x58] sm:$0xf0]  ;;  %v1784_v5 = vor.u32 %v2069_v61, %v1781_v63 }
  0x11   :  { %303 = vmatpush.bf16.msra.mxu1 %v1816_v45  ;;  %332 = vmatpush.bf16.msra.mxu2 %v1820_v46  ;;  %v1788_v6 = vor.u32 %v2072_v1, %v1787_v0  ;;  %v1763_v7 = vld [vmem:[%s3210_s3 + $0x20] sm:$0xf]  ;;  %v2067_v8 = vld [vmem:[%s3210_s3 + $0x2c] sm:$0xf0]  ;;  %v2065_v9 = vld [vmem:[%s3210_s3 + $0x24] sm:$0xf]  ;;  %v1792_v10 = vor.u32 %v2070_v2, %v1789_v3 }
  0x12   :  { %361 = vmatpush.bf16.msra.mxu3 %v1824_v50  ;;  %v1765_v11 = vld [vmem:[%s3210_s3 + $0x30] sm:$0xf0]  ;;  %v1771_v12 = vld [vmem:[%s3210_s3 + $0x28] sm:$0xf]  ;;  %v2068_v13 = vld [vmem:[%s3210_s3 + $0x34] sm:$0xf0]  ;;  %v1764_v16 = vor.u32 %v2067_v8, %v1763_v7 }
  0x13   :  { %v2066_v14 = vld [vmem:[%s3210_s3 + $0x2c] sm:$0xf]  ;;  %v1773_v15 = vld [vmem:[%s3210_s3 + $0x38] sm:$0xf0]  ;;  %v1747_v17 = vld [vmem:[%s3210_s3] sm:$0xf]  ;;  %v1768_v18 = vor.u32 %v2065_v9, %v1765_v11  ;;  %v1772_v19 = vor.u32 %v2068_v13, %v1771_v12 }
  0x14   :  { %275 = vmatpush.bf16.msra.mxu0 %v1796_v56  ;;  %v2063_v20 = vld [vmem:[%s3210_s3 + $0xc] sm:$0xf0]  ;;  %v2061_v21 = vld [vmem:[%s3210_s3 + $0x4] sm:$0xf]  ;;  %v1749_v22 = vld [vmem:[%s3210_s3 + $0x10] sm:$0xf0]  ;;  %v1776_v23 = vor.u32 %v2066_v14, %v1773_v15 }
  0x15   :  { %304 = vmatpush.bf16.msra.mxu1 %v1800_v57  ;;  %333 = vmatpush.bf16.msra.mxu2 %v1804_v58  ;;  %v1755_v24 = vld [vmem:[%s3210_s3 + $0x8] sm:$0xf]  ;;  %v2064_v25 = vld [vmem:[%s3210_s3 + $0x14] sm:$0xf0]  ;;  %v2062_v26 = vld [vmem:[%s3210_s3 + $0xc] sm:$0xf]  ;;  %v1748_v30 = vor.u32 %v2063_v20, %v1747_v17  ;;  %v1752_v33 = vor.u32 %v2061_v21, %v1749_v22 }
  0x16   :  { %362 = vmatpush.bf16.msra.mxu3 %v1808_v62  ;;  %v1757_v27 = vld [vmem:[%s3210_s3 + $0x18] sm:$0xf0]  ;;  %v1987_v28 = vld [vmem:[%s3211_s4 + $0xe0] sm:$0xf]  ;;  %v2123_v29 = vld [vmem:[%s3211_s4 + $0xec] sm:$0xf0]  ;;  %v1756_v34 = vor.u32 %v2064_v25, %v1755_v24 }
  0x17   :  { %v2121_v31 = vld [vmem:[%s3211_s4 + $0xe4] sm:$0xf]  ;;  %v1989_v32 = vld [vmem:[%s3211_s4 + $0xf0] sm:$0xf0]  ;;  %v1760_v36 = vor.u32 %v2062_v26, %v1757_v27  ;;  %v2514_v37 = vor.u32 %v2123_v29, %v1987_v28  ;;  %v1995_v38 = vld [vmem:[%s3211_s4 + $0xe8] sm:$0xf] }
  0x18   :  { %276 = vmatpush.bf16.msra.mxu0 %v1780_v4  ;;  %v2057_v35 = vld [vmem:[%s3212_s0] sm:$0xff]  ;;  %v2124_v39 = vld [vmem:[%s3211_s4 + $0xf4] sm:$0xf0]  ;;  %v2525_v41 = vor.u32 %v2121_v31, %v1989_v32  ;;  %v2119_v42 = vld [vmem:[%s3211_s4 + $0xcc] sm:$0xf0] }
  0x19   :  { %305 = vmatpush.bf16.msra.mxu1 %v1784_v5  ;;  %334 = vmatpush.bf16.msra.mxu2 %v1788_v6  ;;  %v1971_v40 = vld [vmem:[%s3211_s4 + $0xc0] sm:$0xf]  ;;  %v2122_v43 = vld [vmem:[%s3211_s4 + $0xec] sm:$0xf]  ;;  %v1997_v44 = vld [vmem:[%s3211_s4 + $0xf8] sm:$0xf0]  ;;  %v2542_v47 = vor.u32 %v2124_v39, %v1995_v38 }
  0x1a   :  { %363 = vmatpush.bf16.msra.mxu3 %v1792_v10  ;;  %v2117_v45 = vld [vmem:[%s3211_s4 + $0xc4] sm:$0xf]  ;;  %v1973_v46 = vld [vmem:[%s3211_s4 + $0xd0] sm:$0xf0]  ;;  %v2545_v48 = vor.u32 %v2119_v42, %v1971_v40  ;;  %v1979_v49 = vld [vmem:[%s3211_s4 + $0xc8] sm:$0xf]  ;;  %v2553_v51 = vor.u32 %v2122_v43, %v1997_v44 }
  0x1b   :  { %v2120_v50 = vld [vmem:[%s3211_s4 + $0xd4] sm:$0xf0]  ;;  %v1955_v52 = vld [vmem:[%s3211_s4 + $0xa0] sm:$0xf]  ;;  %v2559_v53 = vor.u32 %v2117_v45, %v1973_v46  ;;  %v2115_v54 = vld [vmem:[%s3211_s4 + $0xac] sm:$0xf0] }
  0x1c   :  { %277 = vmatpush.bf16.msra.mxu0 %v1764_v16  ;;  %v2118_v55 = vld [vmem:[%s3211_s4 + $0xcc] sm:$0xf]  ;;  %v1981_v56 = vld [vmem:[%s3211_s4 + $0xd8] sm:$0xf0]  ;;  %v2113_v57 = vld [vmem:[%s3211_s4 + $0xa4] sm:$0xf]  ;;  %v2577_v59 = vor.u32 %v2120_v50, %v1979_v49  ;;  %v2581_v60 = vor.u32 %v2115_v54, %v1955_v52 }
  0x1d   :  { %306 = vmatpush.bf16.msra.mxu1 %v1768_v18  ;;  %335 = vmatpush.bf16.msra.mxu2 %v1772_v19  ;;  %v1957_v58 = vld [vmem:[%s3211_s4 + $0xb0] sm:$0xf0]  ;;  %v1963_v61 = vld [vmem:[%s3211_s4 + $0xa8] sm:$0xf]  ;;  %v2116_v62 = vld [vmem:[%s3211_s4 + $0xb4] sm:$0xf0]  ;;  %v2589_v63 = vor.u32 %v2118_v55, %v1981_v56 }
  0x1e   :  { %364 = vmatpush.bf16.msra.mxu3 %v1776_v23  ;;  %v1939_v0 = vld [vmem:[%s3211_s4 + $0x80] sm:$0xf]  ;;  %v2595_v1 = vor.u32 %v2113_v57, %v1957_v58  ;;  %v2111_v2 = vld [vmem:[%s3211_s4 + $0x8c] sm:$0xf0]  ;;  %v2114_v3 = vld [vmem:[%s3211_s4 + $0xac] sm:$0xf]  ;;  %v2613_v7 = vor.u32 %v2116_v62, %v1963_v61 }
  0x1f   :  { %v1965_v4 = vld [vmem:[%s3211_s4 + $0xb8] sm:$0xf0]  ;;  %v2109_v5 = vld [vmem:[%s3211_s4 + $0x84] sm:$0xf]  ;;  %v1941_v6 = vld [vmem:[%s3211_s4 + $0x90] sm:$0xf0]  ;;  %v2617_v8 = vor.u32 %v2111_v2, %v1939_v0 }
  0x20   :  { %278 = vmatpush.bf16.msra.mxu0 %v1748_v30  ;;  %v1947_v9 = vld [vmem:[%s3211_s4 + $0x88] sm:$0xf]  ;;  %v2112_v10 = vld [vmem:[%s3211_s4 + $0x94] sm:$0xf0]  ;;  %v2625_v11 = vor.u32 %v2114_v3, %v1965_v4  ;;  %v1923_v12 = vld [vmem:[%s3211_s4 + $0x60] sm:$0xf]  ;;  %v2631_v13 = vor.u32 %v2109_v5, %v1941_v6 }
  0x21   :  { %307 = vmatpush.bf16.msra.mxu1 %v1752_v33  ;;  %336 = vmatpush.bf16.msra.mxu2 %v1756_v34  ;;  %v2107_v14 = vld [vmem:[%s3211_s4 + $0x6c] sm:$0xf0]  ;;  %v2110_v15 = vld [vmem:[%s3211_s4 + $0x8c] sm:$0xf]  ;;  %v1949_v16 = vld [vmem:[%s3211_s4 + $0x98] sm:$0xf0]  ;;  %v2652_v20 = vor.u32 %v2112_v10, %v1947_v9 }
  0x22   :  { %365 = vmatpush.bf16.msra.mxu3 %v1760_v36  ;;  %v2105_v17 = vld [vmem:[%s3211_s4 + $0x64] sm:$0xf]  ;;  %v1925_v18 = vld [vmem:[%s3211_s4 + $0x70] sm:$0xf0]  ;;  %v2058_v19 = vld [vmem:[%s3212_s0 + $0x8] sm:$0xff]  ;;  %v2656_v21 = vor.u32 %v2107_v14, %v1923_v12  ;;  %v2664_v24 = vor.u32 %v2110_v15, %v1949_v16 }
  0x23   :  { %279 = vmatmul.bf16.vlgmr.msra.gmra.mxu0 %v2057_v35  ;;  %v1931_v22 = vld [vmem:[%s3211_s4 + $0x68] sm:$0xf]  ;;  %v2108_v23 = vld [vmem:[%s3211_s4 + $0x74] sm:$0xf0]  ;;  %v1907_v25 = vld [vmem:[%s3211_s4 + $0x40] sm:$0xf]  ;;  %v2670_v26 = vor.u32 %v2105_v17, %v1925_v18 }
  0x24   :  { %621 = vmatpush.bf16.msrb.mxu0 %v2514_v37  ;;  %308 = vmatmul.bf16.vlgmr.msra.gmra.mxu1 %v2057_v35  ;;  %v2103_v27 = vld [vmem:[%s3211_s4 + $0x4c] sm:$0xf0]  ;;  %v2106_v28 = vld [vmem:[%s3211_s4 + $0x6c] sm:$0xf]  ;;  %v1933_v29 = vld [vmem:[%s3211_s4 + $0x78] sm:$0xf0]  ;;  %v2688_v32 = vor.u32 %v2108_v23, %v1931_v22 }
  0x25   :  { %634 = vmatpush.bf16.msrb.mxu1 %v2525_v41  ;;  %337 = vmatmul.bf16.vlgmr.msra.gmra.mxu2 %v2057_v35  ;;  %v2101_v30 = vld [vmem:[%s3211_s4 + $0x44] sm:$0xf]  ;;  %v1909_v31 = vld [vmem:[%s3211_s4 + $0x50] sm:$0xf0]  ;;  %v2692_v33 = vor.u32 %v2103_v27, %v1907_v25  ;;  %v1915_v34 = vld [vmem:[%s3211_s4 + $0x48] sm:$0xf]  ;;  %v2700_v36 = vor.u32 %v2106_v28, %v1933_v29 }
  0x26   :  { %366 = vmatmul.bf16.vlgmr.msra.gmra.mxu3 %v2057_v35  ;;  %647 = vmatpush.bf16.msrb.mxu2 %v2542_v47  ;;  %v2104_v35 = vld [vmem:[%s3211_s4 + $0x54] sm:$0xf0]  ;;  %v2703_v38 = vor.u32 %v2101_v30, %v1909_v31  ;;  %v1891_v40 = vld [vmem:[%s3211_s4 + $0x20] sm:$0xf]  ;;  %v2099_v42 = vld [vmem:[%s3211_s4 + $0x2c] sm:$0xf0] }
  0x27   :  { %660 = vmatpush.bf16.msrb.mxu3 %v2553_v51  ;;  %v2706_v39 = vor.u32 %v2104_v35, %v1915_v34  ;;  %v2097_v43 = vld [vmem:[%s3211_s4 + $0x24] sm:$0xf]  ;;  %v2719_v44 = vor.u32 %v2099_v42, %v1891_v40  ;;  %v1893_v45 = vld [vmem:[%s3211_s4 + $0x30] sm:$0xf0]  ;;  %v1899_v46 = vld [vmem:[%s3211_s4 + $0x28] sm:$0xf] }
  0x28   :  { %622 = vmatpush.bf16.msrb.mxu0 %v2545_v48  ;;  %v2100_v49 = vld [vmem:[%s3211_s4 + $0x34] sm:$0xf0]  ;;  %v2731_v50 = vor.u32 %v2097_v43, %v1893_v45  ;;  %v2102_v52 = vld [vmem:[%s3211_s4 + $0x4c] sm:$0xf]  ;;  %v1917_v54 = vld [vmem:[%s3211_s4 + $0x58] sm:$0xf0] }
  0x29   :  { %635 = vmatpush.bf16.msrb.mxu1 %v2559_v53  ;;  %v1875_v55 = vld [vmem:[%s3211_s4] sm:$0xf]  ;;  %v2742_v56 = vor.u32 %v2102_v52, %v1917_v54  ;;  %v2095_v57 = vld [vmem:[%s3211_s4 + $0xc] sm:$0xf0]  ;;  %v2093_v58 = vld [vmem:[%s3211_s4 + $0x4] sm:$0xf]  ;;  %v2754_v62 = vor.u32 %v2100_v49, %v1899_v46 }
  0x2a   :  { %648 = vmatpush.bf16.msrb.mxu2 %v2577_v59  ;;  %v1877_v61 = vld [vmem:[%s3211_s4 + $0x10] sm:$0xf0]  ;;  %v2098_v0 = vld [vmem:[%s3211_s4 + $0x2c] sm:$0xf]  ;;  %v1901_v2 = vld [vmem:[%s3211_s4 + $0x38] sm:$0xf0]  ;;  %v2764_v3 = vor.u32 %v2095_v57, %v1875_v55 }
  0x2b   :  { %661 = vmatpush.bf16.msrb.mxu3 %v2589_v63  ;;  %v2766_v4 = vor.u32 %v2098_v0, %v1901_v2  ;;  %v1883_v5 = vld [vmem:[%s3211_s4 + $0x8] sm:$0xf]  ;;  %v2096_v6 = vld [vmem:[%s3211_s4 + $0x14] sm:$0xf0]  ;;  %v2775_v9 = vor.u32 %v2093_v58, %v1877_v61  ;;  %v2094_v10 = vld [vmem:[%s3211_s4 + $0xc] sm:$0xf] }
  0x2c   :  { %623 = vmatpush.bf16.msrb.mxu0 %v2581_v60  ;;  %v1885_v12 = vld [vmem:[%s3211_s4 + $0x18] sm:$0xf0]  ;;  %v2784_v14 = vor.u32 %v2096_v6, %v1883_v5  ;;  %v2059_v16 = vld [vmem:[%s3212_s0 + $0x10] sm:$0xff]  ;;  %v33_v18 = vld [vmem:[%s3213_s1] sm:$0xff] }
  0x2d   :  { %636 = vmatpush.bf16.msrb.mxu1 %v2595_v1  ;;  %v2788_v15 = vor.u32 %v2094_v10, %v1885_v12  ;;  %v2060_v17 = vld [vmem:[%s3212_s0 + $0x18] sm:$0xff]  ;;  %v77_v25 = vld [vmem:[%s3214_s5] sm:$0xf] }
  0x2e   :  { %649 = vmatpush.bf16.msrb.mxu2 %v2613_v7  ;;  %v80_v28 = vperm.slane %v77_v25, 1  ;;  %v2877_v35 = vperm.slane %v77_v25, 3  ;;  %v2879_v40 = vperm.slane %v77_v25, 2  ;;  %v2881_v42 = vperm.slane %v77_v25, 0 }
  0x2f   :  { %662 = vmatpush.bf16.msrb.mxu3 %v2625_v11 }
  0x30   :  { %624 = vmatpush.bf16.msrb.mxu0 %v2617_v8 }
  0x31   :  { %637 = vmatpush.bf16.msrb.mxu1 %v2631_v13 }
  0x32   :  { %650 = vmatpush.bf16.msrb.mxu2 %v2652_v20 }
  0x33   :  { %663 = vmatpush.bf16.msrb.mxu3 %v2664_v24  ;;  %284 = vmatmul.bf16.gmra.mxu0 %v2058_v19 }
  0x34   :  { %625 = vmatpush.bf16.msrb.mxu0 %v2656_v21  ;;  %313 = vmatmul.bf16.gmra.mxu1 %v2058_v19 }
  0x35   :  { %638 = vmatpush.bf16.msrb.mxu1 %v2670_v26  ;;  %342 = vmatmul.bf16.gmra.mxu2 %v2058_v19 }
  0x36   :  { %371 = vmatmul.bf16.gmra.mxu3 %v2058_v19  ;;  %651 = vmatpush.bf16.msrb.mxu2 %v2688_v32  ;;  %v460_v19 = vpack.c.bf16 %v33_v18, %v33_v18 }
  0x37   :  { %664 = vmatpush.bf16.msrb.mxu3 %v2700_v36 }
  0x38   :  { %626 = vmatpush.bf16.msrb.mxu0 %v2692_v33 }
  0x39   :  { %639 = vmatpush.bf16.msrb.mxu1 %v2703_v38 }
  0x3a   :  { %652 = vmatpush.bf16.msrb.mxu2 %v2706_v39 }
  0x3b   :  { %665 = vmatpush.bf16.msrb.mxu3 %v2742_v56 }
  0x3c   :  { %627 = vmatpush.bf16.msrb.mxu0 %v2719_v44 }
  0x3d   :  { %640 = vmatpush.bf16.msrb.mxu1 %v2731_v50 }
  0x3e   :  { %653 = vmatpush.bf16.msrb.mxu2 %v2754_v62 }
  0x3f   :  { %666 = vmatpush.bf16.msrb.mxu3 %v2766_v4 }
  0x40   :  { %628 = vmatpush.bf16.msrb.mxu0 %v2764_v3 }
  0x41   :  { %641 = vmatpush.bf16.msrb.mxu1 %v2775_v9 }
  0x42   :  { %654 = vmatpush.bf16.msrb.mxu2 %v2784_v14 }
  0x43   :  { %667 = vmatpush.bf16.msrb.mxu3 %v2788_v15  ;;  %289 = vmatmul.bf16.gmra.mxu0 %v2059_v16 }
  0x44   :  { %748 = vmatpush.bf16.msra.mxu0 %v2514_v37  ;;  %318 = vmatmul.bf16.gmra.mxu1 %v2059_v16 }
  0x45   :  { %761 = vmatpush.bf16.msra.mxu1 %v2525_v41  ;;  %347 = vmatmul.bf16.gmra.mxu2 %v2059_v16 }
  0x46   :  { %774 = vmatpush.bf16.msra.mxu2 %v2542_v47  ;;  %376 = vmatmul.bf16.gmra.mxu3 %v2059_v16 }
  0x47   :  { %787 = vmatpush.bf16.msra.mxu3 %v2553_v51 }
  0x48   :  { %749 = vmatpush.bf16.msra.mxu0 %v2545_v48 }
  0x49   :  { %762 = vmatpush.bf16.msra.mxu1 %v2559_v53 }
  0x4a   :  { %775 = vmatpush.bf16.msra.mxu2 %v2577_v59 }
  0x4b   :  { %788 = vmatpush.bf16.msra.mxu3 %v2589_v63 }
  0x4c   :  { %750 = vmatpush.bf16.msra.mxu0 %v2581_v60 }
  0x4d   :  { %763 = vmatpush.bf16.msra.mxu1 %v2595_v1 }
  0x4e   :  { %776 = vmatpush.bf16.msra.mxu2 %v2613_v7 }
  0x4f   :  { %789 = vmatpush.bf16.msra.mxu3 %v2625_v11 }
  0x50   :  { %751 = vmatpush.bf16.msra.mxu0 %v2617_v8 }
  0x51   :  { %764 = vmatpush.bf16.msra.mxu1 %v2631_v13 }
  0x52   :  { %777 = vmatpush.bf16.msra.mxu2 %v2652_v20 }
  0x53   :  { %790 = vmatpush.bf16.msra.mxu3 %v2664_v24  ;;  %294 = vmatmul.bf16.gmra.mxu0 %v2060_v17 }
  0x54   :  { %752 = vmatpush.bf16.msra.mxu0 %v2656_v21  ;;  %323 = vmatmul.bf16.gmra.mxu1 %v2060_v17 }
  0x55   :  { %765 = vmatpush.bf16.msra.mxu1 %v2670_v26  ;;  %352 = vmatmul.bf16.gmra.mxu2 %v2060_v17 }
  0x56   :  { %778 = vmatpush.bf16.msra.mxu2 %v2688_v32  ;;  %381 = vmatmul.bf16.gmra.mxu3 %v2060_v17 }
  0x57   :  { %791 = vmatpush.bf16.msra.mxu3 %v2700_v36 }
  0x58   :  { %753 = vmatpush.bf16.msra.mxu0 %v2692_v33 }
  0x59   :  { %766 = vmatpush.bf16.msra.mxu1 %v2703_v38 }
  0x5a   :  { %779 = vmatpush.bf16.msra.mxu2 %v2706_v39 }
  0x5b   :  { %792 = vmatpush.bf16.msra.mxu3 %v2742_v56 }
  0x5c   :  { %754 = vmatpush.bf16.msra.mxu0 %v2719_v44 }
  0x5d   :  { %767 = vmatpush.bf16.msra.mxu1 %v2731_v50 }
  0x5e   :  { %780 = vmatpush.bf16.msra.mxu2 %v2754_v62 }
  0x5f   :  { %793 = vmatpush.bf16.msra.mxu3 %v2766_v4 }
  0x60   :  { %755 = vmatpush.bf16.msra.mxu0 %v2764_v3 }
  0x61   :  { %768 = vmatpush.bf16.msra.mxu1 %v2775_v9 }
  0x62   :  { %781 = vmatpush.bf16.msra.mxu2 %v2784_v14 }
  0x63   :  { %794 = vmatpush.bf16.msra.mxu3 %v2788_v15  ;;  %629 = vmatmul.bf16.vlgmr.msrb.gmra.mxu0 %v460_v19 }
  0x64   :  { %642 = vmatmul.bf16.vlgmr.msrb.gmra.mxu1 %v460_v19  ;;  %875 = vmatpush.bf16.msrb.mxu0 %v2514_v37 }
  0x65   :  { %655 = vmatmul.bf16.vlgmr.msrb.gmra.mxu2 %v460_v19  ;;  %888 = vmatpush.bf16.msrb.mxu1 %v2525_v41 }
  0x66   :  { %668 = vmatmul.bf16.vlgmr.msrb.gmra.mxu3 %v460_v19  ;;  %901 = vmatpush.bf16.msrb.mxu2 %v2542_v47 }
  0x67   :  { %914 = vmatpush.bf16.msrb.mxu3 %v2553_v51 }
  0x68   :  { %876 = vmatpush.bf16.msrb.mxu0 %v2545_v48 }
  0x69   :  { %889 = vmatpush.bf16.msrb.mxu1 %v2559_v53 }
  0x6a   :  { %902 = vmatpush.bf16.msrb.mxu2 %v2577_v59 }
  0x6b   :  { %915 = vmatpush.bf16.msrb.mxu3 %v2589_v63 }
  0x6c   :  { %877 = vmatpush.bf16.msrb.mxu0 %v2581_v60 }
  0x6d   :  { %890 = vmatpush.bf16.msrb.mxu1 %v2595_v1 }
  0x6e   :  { %903 = vmatpush.bf16.msrb.mxu2 %v2613_v7 }
  0x6f   :  { %916 = vmatpush.bf16.msrb.mxu3 %v2625_v11 }
  0x70   :  { %878 = vmatpush.bf16.msrb.mxu0 %v2617_v8 }
  0x71   :  { %891 = vmatpush.bf16.msrb.mxu1 %v2631_v13 }
  0x72   :  { %904 = vmatpush.bf16.msrb.mxu2 %v2652_v20 }
  0x73   :  { %917 = vmatpush.bf16.msrb.mxu3 %v2664_v24 }
  0x74   :  { %879 = vmatpush.bf16.msrb.mxu0 %v2656_v21 }
  0x75   :  { %892 = vmatpush.bf16.msrb.mxu1 %v2670_v26 }
  0x76   :  { %905 = vmatpush.bf16.msrb.mxu2 %v2688_v32 }
  0x77   :  { %918 = vmatpush.bf16.msrb.mxu3 %v2700_v36 }
  0x78   :  { %880 = vmatpush.bf16.msrb.mxu0 %v2692_v33 }
  0x79   :  { %893 = vmatpush.bf16.msrb.mxu1 %v2703_v38 }
  0x7a   :  { %906 = vmatpush.bf16.msrb.mxu2 %v2706_v39 }
  0x7b   :  { %919 = vmatpush.bf16.msrb.mxu3 %v2742_v56 }
  0x7c   :  { %881 = vmatpush.bf16.msrb.mxu0 %v2719_v44 }
  0x7d   :  { %894 = vmatpush.bf16.msrb.mxu1 %v2731_v50 }
  0x7e   :  { %907 = vmatpush.bf16.msrb.mxu2 %v2754_v62 }
  0x7f   :  { %920 = vmatpush.bf16.msrb.mxu3 %v2766_v4 }
  0x80   :  { %882 = vmatpush.bf16.msrb.mxu0 %v2764_v3 }
  0x81   :  { %895 = vmatpush.bf16.msrb.mxu1 %v2775_v9 }
  0x82   :  { %908 = vmatpush.bf16.msrb.mxu2 %v2784_v14 }
  0x83   :  { %921 = vmatpush.bf16.msrb.mxu3 %v2788_v15 }
  0xa0   :  { %v280_v22 = vpop.f32.mrf.mxu0 }
  0xa1   :  { %v309_v23 = vpop.f32.mrf.mxu1 }
  0xa8   :  { %v2869_v27 = vpop.f32.mrf.mxu2  ;;  %v2873_v30 = vpop.f32.mrf.mxu0 }
  0xa9   :  { %v2871_v29 = vpop.f32.mrf.mxu3  ;;  %v311_v31 = vpop.f32.mrf.mxu1 }
  0xaa   :  { %v2875_v34 = vadd.f32 %v311_v31, %v80_v28 }
  0xb0   :  { %v340_v43 = vpop.f32.mrf.mxu2  ;;  %v285_v49 = vpop.f32.mrf.mxu0 }
  0xb1   :  { %v2884_v45 = vadd.f32 %v340_v43, %v2879_v40  ;;  %v369_v46 = vpop.f32.mrf.mxu3  ;;  %v2890_v54 = vadd.f32 %v285_v49, %v2881_v42  ;;  %v314_v55 = vpop.f32.mrf.mxu1 }
  0xb2   :  { %v2887_v52 = vadd.f32 %v369_v46, %v2877_v35  ;;  %v2892_v57 = vadd.f32 %v314_v55, %v80_v28 }
  0xb8   :  { %v343_v58 = vpop.f32.mrf.mxu2  ;;  %v287_v2 = vpop.f32.mrf.mxu0 }
  0xb9   :  { %v2895_v61 = vadd.f32 %v343_v58, %v2879_v40  ;;  %v372_v0 = vpop.f32.mrf.mxu3  ;;  %v2901_v6 = vadd.f32 %v287_v2, %v2881_v42  ;;  %v316_v10 = vpop.f32.mrf.mxu1 }
  0xba   :  { %v2898_v5 = vadd.f32 %v372_v0, %v2877_v35  ;;  %v2903_v12 = vadd.f32 %v316_v10, %v80_v28 }
  0xbb   :  { %3219 = vst [vmem:[#allocation5_spill] sm:$0xff] %v2895_v61 }
  0xbc   :  { %3220 = vst [vmem:[#allocation6_spill] sm:$0xff] %v2898_v5 }
  0xbd   :  { %3221 = vst [vmem:[#allocation7_spill] sm:$0xff] %v2901_v6 }
  0xbe   :  { %3222 = vst [vmem:[#allocation8_spill] sm:$0xff] %v2903_v12 }
  0xc0   :  { %v345_v16 = vpop.f32.mrf.mxu2  ;;  %v290_v19 = vpop.f32.mrf.mxu0 }
  0xc1   :  { %v2906_v17 = vadd.f32 %v345_v16, %v2879_v40  ;;  %v374_v18 = vpop.f32.mrf.mxu3  ;;  %v2912_v31 = vadd.f32 %v290_v19, %v2881_v42  ;;  %v319_v43 = vpop.f32.mrf.mxu1 }
  0xc2   :  { %v2909_v25 = vadd.f32 %v374_v18, %v2877_v35  ;;  %v2914_v46 = vadd.f32 %v319_v43, %v80_v28 }
  0xc3   :  { %3223 = vst [vmem:[#allocation9_spill] sm:$0xff] %v2906_v17 }
  0xc4   :  { %3224 = vst [vmem:[#allocation10_spill] sm:$0xff] %v2909_v25 }
  0xc5   :  { %3225 = vst [vmem:[#allocation11_spill] sm:$0xff] %v2912_v31 }
  0xc6   :  { %3226 = vst [vmem:[#allocation12_spill] sm:$0xff] %v2914_v46 }
  0xc8   :  { %v348_v49 = vpop.f32.mrf.mxu2  ;;  %v292_v0 = vpop.f32.mrf.mxu0 }
  0xc9   :  { %v2917_v55 = vadd.f32 %v348_v49, %v2879_v40  ;;  %v377_v58 = vpop.f32.mrf.mxu3  ;;  %v2923_v10 = vadd.f32 %v292_v0, %v2881_v42  ;;  %v321_v16 = vpop.f32.mrf.mxu1 }
  0xca   :  { %v2920_v2 = vadd.f32 %v377_v58, %v2877_v35  ;;  %v2925_v18 = vadd.f32 %v321_v16, %v80_v28 }
  0xcb   :  { %3227 = vst [vmem:[#allocation13_spill] sm:$0xff] %v2917_v55 }
  0xcc   :  { %3228 = vst [vmem:[#allocation14_spill] sm:$0xff] %v2920_v2 }
  0xcd   :  { %3229 = vst [vmem:[#allocation15_spill] sm:$0xff] %v2923_v10 }
  0xce   :  { %3230 = vst [vmem:[#allocation16_spill] sm:$0xff] %v2925_v18 }
  0xd0   :  { %v350_v19 = vpop.f32.mrf.mxu2  ;;  %v295_v46 = vpop.f32.mrf.mxu0 }
  0xd1   :  { %v2928_v31 = vadd.f32 %v350_v19, %v2879_v40  ;;  %v379_v43 = vpop.f32.mrf.mxu3  ;;  %v2934_v55 = vadd.f32 %v295_v46, %v2881_v42  ;;  %v324_v58 = vpop.f32.mrf.mxu1  ;;  %v281_v46 = vadd.f32 %v280_v22, %v2881_v42 }
  0xd2   :  { %v2931_v49 = vadd.f32 %v379_v43, %v2877_v35  ;;  %v2936_v2 = vadd.f32 %v324_v58, %v80_v28  ;;  %v310_v58 = vadd.f32 %v309_v23, %v80_v28 }
  0xd3   :  { %3231 = vst [vmem:[#allocation17_spill] sm:$0xff] %v2928_v31 }
  0xd4   :  { %3232 = vst [vmem:[#allocation18_spill] sm:$0xff] %v2931_v49 }
  0xd5   :  { %3233 = vst [vmem:[#allocation19_spill] sm:$0xff] %v2934_v55 }
  0xd6   :  { %3234 = vst [vmem:[#allocation20_spill] sm:$0xff] %v2936_v2 }
  0xd8   :  { %v353_v0 = vpop.f32.mrf.mxu2  ;;  %v297_v18 = vpop.f32.mrf.mxu0 }
  0xd9   :  { %v2939_v10 = vadd.f32 %v353_v0, %v2879_v40  ;;  %v382_v16 = vpop.f32.mrf.mxu3  ;;  %v2945_v31 = vadd.f32 %v297_v18, %v2881_v42  ;;  %v326_v43 = vpop.f32.mrf.mxu1 }
  0xda   :  { %v2942_v19 = vadd.f32 %v382_v16, %v2877_v35  ;;  %v2947_v49 = vadd.f32 %v326_v43, %v80_v28  ;;  %v339_v43 = vadd.f32 %v2869_v27, %v2879_v40  ;;  %v368_v27 = vadd.f32 %v2871_v29, %v2877_v35 }
  0xdb   :  { %3235 = vst [vmem:[#allocation21_spill] sm:$0xff] %v2939_v10 }
  0xdc   :  { %3236 = vst [vmem:[#allocation22_spill] sm:$0xff] %v2942_v19 }
  0xdd   :  { %3237 = vst [vmem:[#allocation23_spill] sm:$0xff] %v2945_v31 }
  0xde   :  { %3238 = vst [vmem:[#allocation24_spill] sm:$0xff] %v2947_v49 }
  0xe0   :  { %v355_v55 = vpop.f32.mrf.mxu2  ;;  %v630_v10 = vpop.f32.mrf.mxu0 }
  0xe1   :  { %v2951_v2 = vadd.f32 %v355_v55, %v2879_v40  ;;  %v384_v0 = vpop.f32.mrf.mxu3  ;;  %v673_v16 = vadd.f32 %v630_v10, %v281_v46  ;;  %v643_v19 = vpop.f32.mrf.mxu1 }
  0xe2   :  { %v2954_v25 = vadd.f32 %v384_v0, %v2877_v35  ;;  %v674_v17 = vadd.f32 %v643_v19, %v310_v58 }
  0xe3   :  { %3239 = vst [vmem:[#allocation25_spill] sm:$0xff] %v2951_v2  ;;  %v2001_v18 = vmul.f32 -1.442695, %v673_v16 }
  0xe4   :  { %3240 = vst [vmem:[#allocation26_spill] sm:$0xff] %v2954_v25  ;;  %v2002_v31 = vmul.f32 -1.442695, %v674_v17 }
  0xe5   :  { %2134 = vpow2.f32 %v2001_v18 }
  0xe6   :  { %2136 = vpow2.f32 %v2002_v31 }
  0xe8   :  { %v656_v22 = vpop.f32.mrf.mxu2  ;;  %v632_v55 = vpop.f32.mrf.mxu0 }
  0xe9   :  { %v675_v23 = vadd.f32 %v656_v22, %v339_v43  ;;  %v669_v28 = vpop.f32.mrf.mxu3  ;;  %v645_v2 = vpop.f32.mrf.mxu1 }
  0xea   :  { %v676_v58 = vadd.f32 %v669_v28, %v368_v27 }
  0xeb   :  { %v2003_v49 = vmul.f32 -1.442695, %v675_v23  ;;  %v2135_v12 = vpop.eup %2134 }
  0xec   :  { %v2137_v6 = vpop.eup %2136  ;;  %v686_v0 = vadd.f32 1.0, %v2135_v12 }
  0xed   :  { %2138 = vpow2.f32 %v2003_v49  ;;  %v687_v10 = vadd.f32 1.0, %v2137_v6 }
  0xee   :  { %2140 = vrcp.f32 %v686_v0  ;;  %v700_v12 = vand.u32 2147483648, %v686_v0  ;;  %v698_v23 = vand.u32 2147483647, %v686_v0  ;;  %vm694_vm2 = vweird.f32 %v686_v0 }
  0xef   :  { %2142 = vrcp.f32 %v687_v10  ;;  %v715_v6 = vand.u32 2147483648, %v687_v10  ;;  %vm709_vm3 = vweird.f32 %v687_v10 }
  0xf0   :  { %v658_v19 = vpop.f32.mrf.mxu2  ;;  %v701_v28 = vor.u32 1.1754944e-38, %v700_v12  ;;  %vm699_vm6 = vcmp.eq.f32.partialorder %v698_v23, 8.507059e+37 }
  0xf1   :  { %v671_v17 = vpop.f32.mrf.mxu3  ;;  %v713_v19 = vand.u32 2147483647, %v687_v10  ;;  %v716_v27 = vor.u32 1.1754944e-38, %v715_v6 }
  0xf3   :  { %v2139_v46 = vpop.eup %2138  ;;  %vm714_vm7 = vcmp.eq.f32.partialorder %v713_v19, 8.507059e+37 }
  0xf4   :  { %v688_v40 = vadd.f32 1.0, %v2139_v46  ;;  %v2141_v31 = vpop.eup %2140 }
  0xf5   :  { %v2143_v16 = vpop.eup %2142  ;;  %v690_v18 = vmul.f32 %v2141_v31, %v686_v0  ;;  %vm695_vm0 = vweird.f32 %v2141_v31 }
  0xf6   :  { %2144 = vrcp.f32 %v688_v40  ;;  %v705_v2 = vmul.f32 %v2143_v16, %v687_v10  ;;  %vm710_vm1 = vweird.f32 %v2143_v16  ;;  %vm696_vm4 = vmor %vm694_vm2, %vm695_vm0  ;;  %v730_v6 = vand.u32 2147483648, %v688_v40 }
  0xf7   :  { %v691_v43 = vsub.f32 1.0, %v690_v18  ;;  %2146 = vtanh.f32 %v676_v58  ;;  %vm711_vm5 = vmor %vm709_vm3, %vm710_vm1  ;;  %v35_v58 = vld [vmem:[%s3215_s2] sm:$0xff]  ;;  %vm724_vm9 = vweird.f32 %v688_v40 }
  0xf8   :  { %v706_v22 = vsub.f32 1.0, %v705_v2  ;;  %v731_v23 = vor.u32 1.1754944e-38, %v730_v6 }
  0xf9   :  { %v692_v49 = vmul.f32 %v2141_v31, %v691_v43 }
  0xfa   :  { %v707_v55 = vmul.f32 %v2143_v16, %v706_v22 }
  0xfb   :  { %v693_v29 = vadd.f32 %v2141_v31, %v692_v49 }
  0xfc   :  { %v2145_v17 = vpop.eup %2144  ;;  %v708_v46 = vadd.f32 %v2143_v16, %v707_v55  ;;  %v728_v55 = vand.u32 2147483647, %v688_v40 }
  0xfd   :  { %v720_v35 = vmul.f32 %v2145_v17, %v688_v40  ;;  %v697_v18 = vsel %vm696_vm4, %v2141_v31, %v693_v29  ;;  %v2147_v2 = vpop.eup %2146  ;;  %vm725_vm8 = vweird.f32 %v2145_v17 }
  0xfe   :  { %v702_v22 = vsel %vm699_vm6, %v701_v28, %v697_v18  ;;  %v712_v25 = vsel %vm711_vm5, %v2143_v16, %v708_v46  ;;  %vm726_vm10 = vmor %vm724_vm9, %vm725_vm8  ;;  %vm729_vm11 = vcmp.eq.f32.partialorder %v728_v55, 8.507059e+37 }
  0xff   :  { %v721_v43 = vsub.f32 1.0, %v720_v35  ;;  %v717_v49 = vsel %vm714_vm7, %v716_v27, %v712_v25  ;;  %v736_v0 = vmul.f32 %v2147_v2, %v702_v22 }
 0x100   :  { %v735_v10 = vmul.f32 %v717_v49, %v35_v58 }
 0x101   :  { %v722_v5 = vmul.f32 %v2145_v17, %v721_v43 }
 0x102   :  { %v2963_v61 = vadd.f32 %v736_v0, %v735_v10 }
 0x103   :  { %v723_v12 = vadd.f32 %v2145_v17, %v722_v5  ;;  %v283_v5 = vadd.f32 %v2873_v30, %v2881_v42 }
 0x104   :  { %2148 = vtanh.f32 %v2963_v61 }
 0x105   :  { %v727_v31 = vsel %vm726_vm10, %v2145_v17, %v723_v12 }
 0x106   :  { %v732_v16 = vsel %vm729_vm11, %v731_v23, %v727_v31 }
 0x10a   :  { %v2149_v29 = vpop.eup %2148 }
 0x10b   :  { %v739_v19 = vmul.f32 %v2149_v29, %v732_v16 }
 0x10d   :  { %v747_v25 = vpack.c.bf16 %v739_v19, %v739_v19 }
 0x10f   :  { %756 = vmatmul.bf16.vlgmr.msra.gmra.mxu0 %v747_v25  ;;  %769 = vmatmul.bf16.vlgmr.msra.gmra.mxu1 %v747_v25 }
 0x110   :  { %782 = vmatmul.bf16.vlgmr.msra.gmra.mxu2 %v747_v25  ;;  %795 = vmatmul.bf16.vlgmr.msra.gmra.mxu3 %v747_v25 }
 0x111   :  { %1002 = vmatpush.bf16.msra.mxu0 %v2514_v37  ;;  %1015 = vmatpush.bf16.msra.mxu1 %v2525_v41 }
 0x112   :  { %1028 = vmatpush.bf16.msra.mxu2 %v2542_v47  ;;  %1041 = vmatpush.bf16.msra.mxu3 %v2553_v51 }
 0x115   :  { %1003 = vmatpush.bf16.msra.mxu0 %v2545_v48  ;;  %1016 = vmatpush.bf16.msra.mxu1 %v2559_v53 }
 0x116   :  { %1029 = vmatpush.bf16.msra.mxu2 %v2577_v59  ;;  %1042 = vmatpush.bf16.msra.mxu3 %v2589_v63 }
 0x119   :  { %1004 = vmatpush.bf16.msra.mxu0 %v2581_v60  ;;  %1017 = vmatpush.bf16.msra.mxu1 %v2595_v1 }
 0x11a   :  { %1030 = vmatpush.bf16.msra.mxu2 %v2613_v7  ;;  %1043 = vmatpush.bf16.msra.mxu3 %v2625_v11 }
 0x11d   :  { %1005 = vmatpush.bf16.msra.mxu0 %v2617_v8  ;;  %1018 = vmatpush.bf16.msra.mxu1 %v2631_v13 }
 0x11e   :  { %1031 = vmatpush.bf16.msra.mxu2 %v2652_v20  ;;  %1044 = vmatpush.bf16.msra.mxu3 %v2664_v24 }
 0x121   :  { %1006 = vmatpush.bf16.msra.mxu0 %v2656_v21  ;;  %1019 = vmatpush.bf16.msra.mxu1 %v2670_v26 }
 0x122   :  { %1032 = vmatpush.bf16.msra.mxu2 %v2688_v32  ;;  %1045 = vmatpush.bf16.msra.mxu3 %v2700_v36 }
 0x125   :  { %1007 = vmatpush.bf16.msra.mxu0 %v2692_v33  ;;  %1020 = vmatpush.bf16.msra.mxu1 %v2703_v38 }
 0x126   :  { %1033 = vmatpush.bf16.msra.mxu2 %v2706_v39  ;;  %1046 = vmatpush.bf16.msra.mxu3 %v2742_v56 }
 0x129   :  { %1008 = vmatpush.bf16.msra.mxu0 %v2719_v44  ;;  %1021 = vmatpush.bf16.msra.mxu1 %v2731_v50 }
 0x12a   :  { %1034 = vmatpush.bf16.msra.mxu2 %v2754_v62  ;;  %1047 = vmatpush.bf16.msra.mxu3 %v2766_v4 }
 0x12d   :  { %1009 = vmatpush.bf16.msra.mxu0 %v2764_v3  ;;  %1022 = vmatpush.bf16.msra.mxu1 %v2775_v9 }
 0x12e   :  { %1035 = vmatpush.bf16.msra.mxu2 %v2784_v14  ;;  %1048 = vmatpush.bf16.msra.mxu3 %v2788_v15 }
 0x18c   :  { %v757_v40 = vpop.f32.mrf.mxu0  ;;  %v770_v17 = vpop.f32.mrf.mxu1 }
 0x18d   :  { %v800_v35 = vadd.f32 %v757_v40, %v283_v5  ;;  %v801_v28 = vadd.f32 %v770_v17, %v2875_v34 }
 0x18f   :  { %v2004_v46 = vmul.f32 -1.442695, %v800_v35  ;;  %v2005_v27 = vmul.f32 -1.442695, %v801_v28 }
 0x191   :  { %2150 = vpow2.f32 %v2004_v46 }
 0x192   :  { %2152 = vpow2.f32 %v2005_v27 }
 0x193   :  { %v783_v58 = vpop.f32.mrf.mxu2  ;;  %v796_v18 = vpop.f32.mrf.mxu3 }
 0x194   :  { %v802_v2 = vadd.f32 %v783_v58, %v2884_v45  ;;  %v759_v43 = vpop.f32.mrf.mxu0  ;;  %v772_v22 = vpop.f32.mrf.mxu1  ;;  %v803_v23 = vadd.f32 %v796_v18, %v2887_v52 }
 0x196   :  { %v2006_v49 = vmul.f32 -1.442695, %v802_v2 }
 0x197   :  { %v2151_v0 = vpop.eup %2150 }
 0x198   :  { %v2153_v10 = vpop.eup %2152  ;;  %v813_v12 = vadd.f32 1.0, %v2151_v0  ;;  %2154 = vpow2.f32 %v2006_v49 }
 0x199   :  { %v814_v30 = vadd.f32 1.0, %v2153_v10 }
 0x19a   :  { %2156 = vrcp.f32 %v813_v12  ;;  %v827_v5 = vand.u32 2147483648, %v813_v12  ;;  %v825_v35 = vand.u32 2147483647, %v813_v12  ;;  %vm821_vm14 = vweird.f32 %v813_v12 }
 0x19b   :  { %2158 = vrcp.f32 %v814_v30  ;;  %v785_v42 = vpop.f32.mrf.mxu2  ;;  %v798_v34 = vpop.f32.mrf.mxu3  ;;  %v842_v40 = vand.u32 2147483648, %v814_v30  ;;  %v840_v46 = vand.u32 2147483647, %v814_v30  ;;  %vm836_vm15 = vweird.f32 %v814_v30 }
 0x19c   :  { %v828_v18 = vor.u32 1.1754944e-38, %v827_v5  ;;  %vm826_vm2 = vcmp.eq.f32.partialorder %v825_v35, 8.507059e+37 }
 0x19d   :  { %v843_v43 = vor.u32 1.1754944e-38, %v842_v40  ;;  %vm841_vm3 = vcmp.eq.f32.partialorder %v840_v46, 8.507059e+37 }
 0x19e   :  { %v2155_v6 = vpop.eup %2154 }
 0x19f   :  { %v815_v55 = vadd.f32 1.0, %v2155_v6 }
 0x1a0   :  { %v2157_v31 = vpop.eup %2156 }
 0x1a1   :  { %v2159_v29 = vpop.eup %2158  ;;  %v817_v16 = vmul.f32 %v2157_v31, %v813_v12  ;;  %2160 = vrcp.f32 %v815_v55  ;;  %vm822_vm12 = vweird.f32 %v2157_v31  ;;  %vm851_vm5 = vweird.f32 %v815_v55 }
 0x1a2   :  { %v832_v45 = vmul.f32 %v2159_v29, %v814_v30  ;;  %2162 = vtanh.f32 %v803_v23  ;;  %vm837_vm13 = vweird.f32 %v2159_v29  ;;  %vm823_vm0 = vmor %vm821_vm14, %vm822_vm12 }
 0x1a3   :  { %v818_v19 = vsub.f32 1.0, %v817_v16  ;;  %vm838_vm1 = vmor %vm836_vm15, %vm837_vm13 }
 0x1a4   :  { %v833_v25 = vsub.f32 1.0, %v832_v45  ;;  %v857_v45 = vand.u32 2147483648, %v815_v55 }
 0x1a5   :  { %v819_v17 = vmul.f32 %v2157_v31, %v818_v19 }
 0x1a6   :  { %v834_v28 = vmul.f32 %v2159_v29, %v833_v25  ;;  %v858_v25 = vor.u32 1.1754944e-38, %v857_v45 }
 0x1a7   :  { %v2161_v27 = vpop.eup %2160  ;;  %v820_v58 = vadd.f32 %v2157_v31, %v819_v17 }
 0x1a8   :  { %v847_v52 = vmul.f32 %v2161_v27, %v815_v55  ;;  %v835_v2 = vadd.f32 %v2159_v29, %v834_v28  ;;  %v2163_v49 = vpop.eup %2162  ;;  %vm852_vm4 = vweird.f32 %v2161_v27 }
 0x1a9   :  { %v824_v22 = vsel %vm823_vm0, %v2157_v31, %v820_v58  ;;  %v855_v31 = vand.u32 2147483647, %v815_v55  ;;  %vm853_vm6 = vmor %vm851_vm5, %vm852_vm4 }
 0x1aa   :  { %v848_v0 = vsub.f32 1.0, %v847_v52  ;;  %v829_v10 = vsel %vm826_vm2, %v828_v18, %v824_v22  ;;  %v839_v42 = vsel %vm838_vm1, %v2159_v29, %v835_v2  ;;  %v3241_v18 = vld [vmem:[#allocation5_spill] sm:$0xff] }
 0x1ab   :  { %v844_v34 = vsel %vm841_vm3, %v843_v43, %v839_v42  ;;  %v863_v6 = vmul.f32 %v2163_v49, %v829_v10  ;;  %vm856_vm7 = vcmp.eq.f32.partialorder %v855_v31, 8.507059e+37 }
 0x1ac   :  { %v862_v23 = vmul.f32 %v844_v34, %v2963_v61  ;;  %v849_v16 = vmul.f32 %v2161_v27, %v848_v0 }
 0x1ae   :  { %v3004_v12 = vadd.f32 %v863_v6, %v862_v23  ;;  %v850_v30 = vadd.f32 %v2161_v27, %v849_v16 }
 0x1b0   :  { %2164 = vtanh.f32 %v3004_v12  ;;  %v854_v19 = vsel %vm853_vm6, %v2161_v27, %v850_v30  ;;  %v3242_v30 = vld [vmem:[#allocation6_spill] sm:$0xff] }
 0x1b1   :  { %v859_v5 = vsel %vm856_vm7, %v858_v25, %v854_v19 }
 0x1b6   :  { %v2165_v29 = vpop.eup %2164 }
 0x1b7   :  { %v866_v40 = vmul.f32 %v2165_v29, %v859_v5 }
 0x1b9   :  { %v874_v17 = vpack.c.bf16 %v866_v40, %v866_v40 }
 0x1bb   :  { %883 = vmatmul.bf16.vlgmr.msrb.gmra.mxu0 %v874_v17  ;;  %896 = vmatmul.bf16.vlgmr.msrb.gmra.mxu1 %v874_v17 }
 0x1bc   :  { %909 = vmatmul.bf16.vlgmr.msrb.gmra.mxu2 %v874_v17  ;;  %922 = vmatmul.bf16.vlgmr.msrb.gmra.mxu3 %v874_v17 }
 0x1bd   :  { %1129 = vmatpush.bf16.msrb.mxu0 %v2514_v37  ;;  %1142 = vmatpush.bf16.msrb.mxu1 %v2525_v41 }
 0x1be   :  { %1155 = vmatpush.bf16.msrb.mxu2 %v2542_v47  ;;  %1168 = vmatpush.bf16.msrb.mxu3 %v2553_v51 }
 0x1c1   :  { %1130 = vmatpush.bf16.msrb.mxu0 %v2545_v48  ;;  %1143 = vmatpush.bf16.msrb.mxu1 %v2559_v53 }
 0x1c2   :  { %1156 = vmatpush.bf16.msrb.mxu2 %v2577_v59  ;;  %1169 = vmatpush.bf16.msrb.mxu3 %v2589_v63 }
 0x1c5   :  { %1131 = vmatpush.bf16.msrb.mxu0 %v2581_v60  ;;  %1144 = vmatpush.bf16.msrb.mxu1 %v2595_v1 }
 0x1c6   :  { %1157 = vmatpush.bf16.msrb.mxu2 %v2613_v7  ;;  %1170 = vmatpush.bf16.msrb.mxu3 %v2625_v11 }
 0x1c9   :  { %1132 = vmatpush.bf16.msrb.mxu0 %v2617_v8  ;;  %1145 = vmatpush.bf16.msrb.mxu1 %v2631_v13 }
 0x1ca   :  { %1158 = vmatpush.bf16.msrb.mxu2 %v2652_v20  ;;  %1171 = vmatpush.bf16.msrb.mxu3 %v2664_v24 }
 0x1cd   :  { %1133 = vmatpush.bf16.msrb.mxu0 %v2656_v21  ;;  %1146 = vmatpush.bf16.msrb.mxu1 %v2670_v26 }
 0x1ce   :  { %1159 = vmatpush.bf16.msrb.mxu2 %v2688_v32  ;;  %1172 = vmatpush.bf16.msrb.mxu3 %v2700_v36 }
 0x1d1   :  { %1134 = vmatpush.bf16.msrb.mxu0 %v2692_v33  ;;  %1147 = vmatpush.bf16.msrb.mxu1 %v2703_v38 }
 0x1d2   :  { %1160 = vmatpush.bf16.msrb.mxu2 %v2706_v39  ;;  %1173 = vmatpush.bf16.msrb.mxu3 %v2742_v56 }
 0x1d5   :  { %1135 = vmatpush.bf16.msrb.mxu0 %v2719_v44  ;;  %1148 = vmatpush.bf16.msrb.mxu1 %v2731_v50 }
 0x1d6   :  { %1161 = vmatpush.bf16.msrb.mxu2 %v2754_v62  ;;  %1174 = vmatpush.bf16.msrb.mxu3 %v2766_v4 }
 0x1d9   :  { %1136 = vmatpush.bf16.msrb.mxu0 %v2764_v3  ;;  %1149 = vmatpush.bf16.msrb.mxu1 %v2775_v9 }
 0x1da   :  { %1162 = vmatpush.bf16.msrb.mxu2 %v2784_v14  ;;  %1175 = vmatpush.bf16.msrb.mxu3 %v2788_v15 }
 0x238   :  { %v884_v61 = vpop.f32.mrf.mxu0  ;;  %v897_v55 = vpop.f32.mrf.mxu1 }
 0x239   :  { %v927_v35 = vadd.f32 %v884_v61, %v2890_v54  ;;  %v928_v28 = vadd.f32 %v897_v55, %v2892_v57 }
 0x23b   :  { %v2007_v46 = vmul.f32 -1.442695, %v927_v35  ;;  %v2008_v27 = vmul.f32 -1.442695, %v928_v28 }
 0x23d   :  { %2166 = vpow2.f32 %v2007_v46 }
 0x23e   :  { %2168 = vpow2.f32 %v2008_v27 }
 0x23f   :  { %v910_v58 = vpop.f32.mrf.mxu2  ;;  %v923_v52 = vpop.f32.mrf.mxu3 }
 0x240   :  { %v929_v2 = vadd.f32 %v910_v58, %v3241_v18  ;;  %v886_v43 = vpop.f32.mrf.mxu0  ;;  %v899_v22 = vpop.f32.mrf.mxu1  ;;  %v930_v45 = vadd.f32 %v923_v52, %v3242_v30 }
 0x242   :  { %v2009_v49 = vmul.f32 -1.442695, %v929_v2 }
 0x243   :  { %v2167_v0 = vpop.eup %2166 }
 0x244   :  { %v2169_v10 = vpop.eup %2168  ;;  %v940_v42 = vadd.f32 1.0, %v2167_v0  ;;  %2170 = vpow2.f32 %v2009_v49 }
 0x245   :  { %v941_v34 = vadd.f32 1.0, %v2169_v10 }
 0x246   :  { %2172 = vrcp.f32 %v940_v42  ;;  %v954_v40 = vand.u32 2147483648, %v940_v42  ;;  %v952_v55 = vand.u32 2147483647, %v940_v42  ;;  %vm948_vm10 = vweird.f32 %v940_v42 }
 0x247   :  { %2174 = vrcp.f32 %v941_v34  ;;  %v912_v54 = vpop.f32.mrf.mxu2  ;;  %v925_v57 = vpop.f32.mrf.mxu3  ;;  %v969_v17 = vand.u32 2147483648, %v941_v34  ;;  %v967_v28 = vand.u32 2147483647, %v941_v34  ;;  %vm963_vm11 = vweird.f32 %v941_v34 }
 0x248   :  { %v955_v52 = vor.u32 1.1754944e-38, %v954_v40  ;;  %vm953_vm14 = vcmp.eq.f32.partialorder %v952_v55, 8.507059e+37  ;;  %v3244_v55 = vld [vmem:[#allocation8_spill] sm:$0xff] }
 0x249   :  { %v970_v2 = vor.u32 1.1754944e-38, %v969_v17  ;;  %vm968_vm15 = vcmp.eq.f32.partialorder %v967_v28, 8.507059e+37  ;;  %v3243_v17 = vld [vmem:[#allocation7_spill] sm:$0xff] }
 0x24a   :  { %v2171_v6 = vpop.eup %2170 }
 0x24b   :  { %v942_v23 = vadd.f32 1.0, %v2171_v6 }
 0x24c   :  { %v2173_v16 = vpop.eup %2172 }
 0x24d   :  { %v2175_v31 = vpop.eup %2174  ;;  %v944_v19 = vmul.f32 %v2173_v16, %v940_v42  ;;  %2176 = vrcp.f32 %v942_v23  ;;  %vm949_vm8 = vweird.f32 %v2173_v16  ;;  %vm978_vm1 = vweird.f32 %v942_v23 }
 0x24e   :  { %v959_v25 = vmul.f32 %v2175_v31, %v941_v34  ;;  %2178 = vtanh.f32 %v930_v45  ;;  %vm964_vm9 = vweird.f32 %v2175_v31  ;;  %vm950_vm12 = vmor %vm948_vm10, %vm949_vm8  ;;  %v984_v45 = vand.u32 2147483648, %v942_v23 }
 0x24f   :  { %v945_v29 = vsub.f32 1.0, %v944_v19  ;;  %vm965_vm13 = vmor %vm963_vm11, %vm964_vm9 }
 0x250   :  { %v960_v5 = vsub.f32 1.0, %v959_v25  ;;  %v985_v25 = vor.u32 1.1754944e-38, %v984_v45 }
 0x251   :  { %v946_v61 = vmul.f32 %v2173_v16, %v945_v29 }
 0x252   :  { %v961_v35 = vmul.f32 %v2175_v31, %v960_v5 }
 0x253   :  { %v2177_v46 = vpop.eup %2176  ;;  %v947_v27 = vadd.f32 %v2173_v16, %v946_v61 }
 0x254   :  { %v974_v58 = vmul.f32 %v2177_v46, %v942_v23  ;;  %v962_v18 = vadd.f32 %v2175_v31, %v961_v35  ;;  %v2179_v22 = vpop.eup %2178  ;;  %vm979_vm0 = vweird.f32 %v2177_v46 }
 0x255   :  { %v951_v43 = vsel %vm950_vm12, %v2173_v16, %v947_v27  ;;  %v982_v16 = vand.u32 2147483647, %v942_v23  ;;  %vm980_vm2 = vmor %vm978_vm1, %vm979_vm0 }
 0x256   :  { %v975_v49 = vsub.f32 1.0, %v974_v58  ;;  %v956_v0 = vsel %vm953_vm14, %v955_v52, %v951_v43  ;;  %v966_v10 = vsel %vm965_vm13, %v2175_v31, %v962_v18  ;;  %v3245_v52 = vld [vmem:[#allocation9_spill] sm:$0xff] }
 0x257   :  { %v971_v54 = vsel %vm968_vm15, %v970_v2, %v966_v10  ;;  %v990_v57 = vmul.f32 %v2179_v22, %v956_v0  ;;  %vm983_vm3 = vcmp.eq.f32.partialorder %v982_v16, 8.507059e+37  ;;  %v3246_v16 = vld [vmem:[#allocation10_spill] sm:$0xff] }
 0x258   :  { %v989_v6 = vmul.f32 %v971_v54, %v3004_v12  ;;  %v976_v30 = vmul.f32 %v2177_v46, %v975_v49 }
 0x25a   :  { %v3044_v42 = vadd.f32 %v990_v57, %v989_v6  ;;  %v977_v34 = vadd.f32 %v2177_v46, %v976_v30 }
 0x25c   :  { %2180 = vtanh.f32 %v3044_v42  ;;  %v981_v19 = vsel %vm980_vm2, %v2177_v46, %v977_v34 }
 0x25d   :  { %v986_v29 = vsel %vm983_vm3, %v985_v25, %v981_v19 }
 0x262   :  { %v2181_v31 = vpop.eup %2180 }
 0x263   :  { %v993_v5 = vmul.f32 %v2181_v31, %v986_v29 }
 0x265   :  { %v1001_v40 = vpack.c.bf16 %v993_v5, %v993_v5 }
 0x267   :  { %1010 = vmatmul.bf16.vlgmr.msra.gmra.mxu0 %v1001_v40  ;;  %1023 = vmatmul.bf16.vlgmr.msra.gmra.mxu1 %v1001_v40 }
 0x268   :  { %1036 = vmatmul.bf16.vlgmr.msra.gmra.mxu2 %v1001_v40  ;;  %1049 = vmatmul.bf16.vlgmr.msra.gmra.mxu3 %v1001_v40 }
 0x269   :  { %1256 = vmatpush.bf16.msra.mxu0 %v2514_v37  ;;  %1269 = vmatpush.bf16.msra.mxu1 %v2525_v41 }
 0x26a   :  { %1282 = vmatpush.bf16.msra.mxu2 %v2542_v47  ;;  %1295 = vmatpush.bf16.msra.mxu3 %v2553_v51 }
 0x26d   :  { %1257 = vmatpush.bf16.msra.mxu0 %v2545_v48  ;;  %1270 = vmatpush.bf16.msra.mxu1 %v2559_v53 }
 0x26e   :  { %1283 = vmatpush.bf16.msra.mxu2 %v2577_v59  ;;  %1296 = vmatpush.bf16.msra.mxu3 %v2589_v63 }
 0x271   :  { %1258 = vmatpush.bf16.msra.mxu0 %v2581_v60  ;;  %1271 = vmatpush.bf16.msra.mxu1 %v2595_v1 }
 0x272   :  { %1284 = vmatpush.bf16.msra.mxu2 %v2613_v7  ;;  %1297 = vmatpush.bf16.msra.mxu3 %v2625_v11 }
 0x275   :  { %1259 = vmatpush.bf16.msra.mxu0 %v2617_v8  ;;  %1272 = vmatpush.bf16.msra.mxu1 %v2631_v13 }
 0x276   :  { %1285 = vmatpush.bf16.msra.mxu2 %v2652_v20  ;;  %1298 = vmatpush.bf16.msra.mxu3 %v2664_v24 }
 0x279   :  { %1260 = vmatpush.bf16.msra.mxu0 %v2656_v21  ;;  %1273 = vmatpush.bf16.msra.mxu1 %v2670_v26 }
 0x27a   :  { %1286 = vmatpush.bf16.msra.mxu2 %v2688_v32  ;;  %1299 = vmatpush.bf16.msra.mxu3 %v2700_v36 }
 0x27d   :  { %1261 = vmatpush.bf16.msra.mxu0 %v2692_v33  ;;  %1274 = vmatpush.bf16.msra.mxu1 %v2703_v38 }
 0x27e   :  { %1287 = vmatpush.bf16.msra.mxu2 %v2706_v39  ;;  %1300 = vmatpush.bf16.msra.mxu3 %v2742_v56 }
 0x281   :  { %1262 = vmatpush.bf16.msra.mxu0 %v2719_v44  ;;  %1275 = vmatpush.bf16.msra.mxu1 %v2731_v50 }
 0x282   :  { %1288 = vmatpush.bf16.msra.mxu2 %v2754_v62  ;;  %1301 = vmatpush.bf16.msra.mxu3 %v2766_v4 }
 0x285   :  { %1263 = vmatpush.bf16.msra.mxu0 %v2764_v3  ;;  %1276 = vmatpush.bf16.msra.mxu1 %v2775_v9 }
 0x286   :  { %1289 = vmatpush.bf16.msra.mxu2 %v2784_v14  ;;  %1302 = vmatpush.bf16.msra.mxu3 %v2788_v15 }
 0x2e4   :  { %v1011_v12 = vpop.f32.mrf.mxu0  ;;  %v1024_v23 = vpop.f32.mrf.mxu1 }
 0x2e5   :  { %v1054_v61 = vadd.f32 %v1011_v12, %v3243_v17  ;;  %v1055_v35 = vadd.f32 %v1024_v23, %v3244_v55 }
 0x2e7   :  { %v2010_v28 = vmul.f32 -1.442695, %v1054_v61  ;;  %v2011_v46 = vmul.f32 -1.442695, %v1055_v35 }
 0x2e9   :  { %2182 = vpow2.f32 %v2010_v28 }
 0x2ea   :  { %2184 = vpow2.f32 %v2011_v46 }
 0x2eb   :  { %v1037_v27 = vpop.f32.mrf.mxu2  ;;  %v1050_v58 = vpop.f32.mrf.mxu3 }
 0x2ec   :  { %v1056_v18 = vadd.f32 %v1037_v27, %v3245_v52  ;;  %v1013_v2 = vpop.f32.mrf.mxu0  ;;  %v1026_v43 = vpop.f32.mrf.mxu1  ;;  %v1057_v19 = vadd.f32 %v1050_v58, %v3246_v16 }
 0x2ee   :  { %v2012_v22 = vmul.f32 -1.442695, %v1056_v18 }
 0x2ef   :  { %v2183_v49 = vpop.eup %2182 }
 0x2f0   :  { %v2185_v0 = vpop.eup %2184  ;;  %v1067_v10 = vadd.f32 1.0, %v2183_v49  ;;  %2186 = vpow2.f32 %v2012_v22 }
 0x2f1   :  { %v1068_v54 = vadd.f32 1.0, %v2185_v0 }
 0x2f2   :  { %2188 = vrcp.f32 %v1067_v10  ;;  %v1081_v12 = vand.u32 2147483648, %v1067_v10  ;;  %v1079_v61 = vand.u32 2147483647, %v1067_v10  ;;  %vm1075_vm6 = vweird.f32 %v1067_v10 }
 0x2f3   :  { %2190 = vrcp.f32 %v1068_v54  ;;  %v1039_v57 = vpop.f32.mrf.mxu2  ;;  %v1052_v6 = vpop.f32.mrf.mxu3  ;;  %v1096_v23 = vand.u32 2147483648, %v1068_v54  ;;  %v1094_v35 = vand.u32 2147483647, %v1068_v54  ;;  %vm1090_vm7 = vweird.f32 %v1068_v54 }
 0x2f4   :  { %v1082_v58 = vor.u32 1.1754944e-38, %v1081_v12  ;;  %vm1080_vm10 = vcmp.eq.f32.partialorder %v1079_v61, 8.507059e+37  ;;  %v3248_v61 = vld [vmem:[#allocation12_spill] sm:$0xff] }
 0x2f5   :  { %v1097_v18 = vor.u32 1.1754944e-38, %v1096_v23  ;;  %vm1095_vm11 = vcmp.eq.f32.partialorder %v1094_v35, 8.507059e+37  ;;  %v3247_v23 = vld [vmem:[#allocation11_spill] sm:$0xff] }
 0x2f6   :  { %v2187_v30 = vpop.eup %2186 }
 0x2f7   :  { %v1069_v34 = vadd.f32 1.0, %v2187_v30 }
 0x2f8   :  { %v2189_v45 = vpop.eup %2188 }
 0x2f9   :  { %v2191_v25 = vpop.eup %2190  ;;  %v1071_v31 = vmul.f32 %v2189_v45, %v1067_v10  ;;  %2192 = vrcp.f32 %v1069_v34  ;;  %vm1076_vm4 = vweird.f32 %v2189_v45  ;;  %vm1105_vm13 = vweird.f32 %v1069_v34 }
 0x2fa   :  { %v1086_v29 = vmul.f32 %v2191_v25, %v1068_v54  ;;  %2194 = vtanh.f32 %v1057_v19  ;;  %vm1091_vm5 = vweird.f32 %v2191_v25  ;;  %vm1077_vm8 = vmor %vm1075_vm6, %vm1076_vm4  ;;  %v1111_v19 = vand.u32 2147483648, %v1069_v34 }
 0x2fb   :  { %v1072_v5 = vsub.f32 1.0, %v1071_v31  ;;  %vm1092_vm9 = vmor %vm1090_vm7, %vm1091_vm5 }
 0x2fc   :  { %v1087_v40 = vsub.f32 1.0, %v1086_v29  ;;  %v1112_v29 = vor.u32 1.1754944e-38, %v1111_v19 }
 0x2fd   :  { %v1073_v17 = vmul.f32 %v2189_v45, %v1072_v5 }
 0x2fe   :  { %v1088_v55 = vmul.f32 %v2191_v25, %v1087_v40 }
 0x2ff   :  { %v2193_v28 = vpop.eup %2192  ;;  %v1074_v46 = vadd.f32 %v2189_v45, %v1073_v17 }
 0x300   :  { %v1101_v27 = vmul.f32 %v2193_v28, %v1069_v34  ;;  %v1089_v52 = vadd.f32 %v2191_v25, %v1088_v55  ;;  %v2195_v43 = vpop.eup %2194  ;;  %vm1106_vm12 = vweird.f32 %v2193_v28 }
 0x301   :  { %v1078_v2 = vsel %vm1077_vm8, %v2189_v45, %v1074_v46  ;;  %v1109_v45 = vand.u32 2147483647, %v1069_v34  ;;  %vm1107_vm14 = vmor %vm1105_vm13, %vm1106_vm12 }
 0x302   :  { %v1102_v22 = vsub.f32 1.0, %v1101_v27  ;;  %v1083_v49 = vsel %vm1080_vm10, %v1082_v58, %v1078_v2  ;;  %v1093_v0 = vsel %vm1092_vm9, %v2191_v25, %v1089_v52  ;;  %v3249_v58 = vld [vmem:[#allocation13_spill] sm:$0xff] }
 0x303   :  { %v1098_v57 = vsel %vm1095_vm11, %v1097_v18, %v1093_v0  ;;  %v1117_v6 = vmul.f32 %v2195_v43, %v1083_v49  ;;  %vm1110_vm15 = vcmp.eq.f32.partialorder %v1109_v45, 8.507059e+37  ;;  %v3250_v45 = vld [vmem:[#allocation14_spill] sm:$0xff] }
 0x304   :  { %v1116_v30 = vmul.f32 %v1098_v57, %v3044_v42  ;;  %v1103_v16 = vmul.f32 %v2193_v28, %v1102_v22 }
 0x306   :  { %v3084_v10 = vadd.f32 %v1117_v6, %v1116_v30  ;;  %v1104_v54 = vadd.f32 %v2193_v28, %v1103_v16 }
 0x308   :  { %2196 = vtanh.f32 %v3084_v10  ;;  %v1108_v31 = vsel %vm1107_vm14, %v2193_v28, %v1104_v54 }
 0x309   :  { %v1113_v5 = vsel %vm1110_vm15, %v1112_v29, %v1108_v31 }
 0x30e   :  { %v2197_v25 = vpop.eup %2196 }
 0x30f   :  { %v1120_v40 = vmul.f32 %v2197_v25, %v1113_v5 }
 0x311   :  { %v1128_v12 = vpack.c.bf16 %v1120_v40, %v1120_v40 }
 0x313   :  { %1137 = vmatmul.bf16.vlgmr.msrb.gmra.mxu0 %v1128_v12  ;;  %1150 = vmatmul.bf16.vlgmr.msrb.gmra.mxu1 %v1128_v12 }
 0x314   :  { %1163 = vmatmul.bf16.vlgmr.msrb.gmra.mxu2 %v1128_v12  ;;  %1176 = vmatmul.bf16.vlgmr.msrb.gmra.mxu3 %v1128_v12 }
 0x315   :  { %1383 = vmatpush.bf16.msrb.mxu0 %v2514_v37  ;;  %1396 = vmatpush.bf16.msrb.mxu1 %v2525_v41 }
 0x316   :  { %1409 = vmatpush.bf16.msrb.mxu2 %v2542_v47  ;;  %1422 = vmatpush.bf16.msrb.mxu3 %v2553_v51 }
 0x319   :  { %1384 = vmatpush.bf16.msrb.mxu0 %v2545_v48  ;;  %1397 = vmatpush.bf16.msrb.mxu1 %v2559_v53 }
 0x31a   :  { %1410 = vmatpush.bf16.msrb.mxu2 %v2577_v59  ;;  %1423 = vmatpush.bf16.msrb.mxu3 %v2589_v63 }
 0x31d   :  { %1385 = vmatpush.bf16.msrb.mxu0 %v2581_v60  ;;  %1398 = vmatpush.bf16.msrb.mxu1 %v2595_v1 }
 0x31e   :  { %1411 = vmatpush.bf16.msrb.mxu2 %v2613_v7  ;;  %1424 = vmatpush.bf16.msrb.mxu3 %v2625_v11 }
 0x321   :  { %1386 = vmatpush.bf16.msrb.mxu0 %v2617_v8  ;;  %1399 = vmatpush.bf16.msrb.mxu1 %v2631_v13 }
 0x322   :  { %1412 = vmatpush.bf16.msrb.mxu2 %v2652_v20  ;;  %1425 = vmatpush.bf16.msrb.mxu3 %v2664_v24 }
 0x325   :  { %1387 = vmatpush.bf16.msrb.mxu0 %v2656_v21  ;;  %1400 = vmatpush.bf16.msrb.mxu1 %v2670_v26 }
 0x326   :  { %1413 = vmatpush.bf16.msrb.mxu2 %v2688_v32  ;;  %1426 = vmatpush.bf16.msrb.mxu3 %v2700_v36 }
 0x329   :  { %1388 = vmatpush.bf16.msrb.mxu0 %v2692_v33  ;;  %1401 = vmatpush.bf16.msrb.mxu1 %v2703_v38 }
 0x32a   :  { %1414 = vmatpush.bf16.msrb.mxu2 %v2706_v39  ;;  %1427 = vmatpush.bf16.msrb.mxu3 %v2742_v56 }
 0x32d   :  { %1389 = vmatpush.bf16.msrb.mxu0 %v2719_v44  ;;  %1402 = vmatpush.bf16.msrb.mxu1 %v2731_v50 }
 0x32e   :  { %1415 = vmatpush.bf16.msrb.mxu2 %v2754_v62  ;;  %1428 = vmatpush.bf16.msrb.mxu3 %v2766_v4 }
 0x331   :  { %1390 = vmatpush.bf16.msrb.mxu0 %v2764_v3  ;;  %1403 = vmatpush.bf16.msrb.mxu1 %v2775_v9 }
 0x332   :  { %1416 = vmatpush.bf16.msrb.mxu2 %v2784_v14  ;;  %1429 = vmatpush.bf16.msrb.mxu3 %v2788_v15 }
 0x390   :  { %v1138_v42 = vpop.f32.mrf.mxu0  ;;  %v1151_v34 = vpop.f32.mrf.mxu1 }
 0x391   :  { %v1181_v17 = vadd.f32 %v1138_v42, %v3247_v23  ;;  %v1182_v55 = vadd.f32 %v1151_v34, %v3248_v61 }
 0x393   :  { %v2013_v35 = vmul.f32 -1.442695, %v1181_v17  ;;  %v2014_v28 = vmul.f32 -1.442695, %v1182_v55 }
 0x395   :  { %2198 = vpow2.f32 %v2013_v35 }
 0x396   :  { %2200 = vpow2.f32 %v2014_v28 }
 0x397   :  { %v1164_v46 = vpop.f32.mrf.mxu2  ;;  %v1177_v27 = vpop.f32.mrf.mxu3 }
 0x398   :  { %v1183_v52 = vadd.f32 %v1164_v46, %v3249_v58  ;;  %v1140_v18 = vpop.f32.mrf.mxu0  ;;  %v1153_v2 = vpop.f32.mrf.mxu1  ;;  %v1184_v31 = vadd.f32 %v1177_v27, %v3250_v45 }
 0x39a   :  { %v2015_v43 = vmul.f32 -1.442695, %v1183_v52 }
 0x39b   :  { %v2199_v22 = vpop.eup %2198 }
 0x39c   :  { %v2201_v49 = vpop.eup %2200  ;;  %v1194_v0 = vadd.f32 1.0, %v2199_v22  ;;  %2202 = vpow2.f32 %v2015_v43 }
 0x39d   :  { %v1195_v57 = vadd.f32 1.0, %v2201_v49 }
 0x39e   :  { %2204 = vrcp.f32 %v1194_v0  ;;  %v1208_v42 = vand.u32 2147483648, %v1194_v0  ;;  %v1206_v17 = vand.u32 2147483647, %v1194_v0  ;;  %vm1202_vm2 = vweird.f32 %v1194_v0 }
 0x39f   :  { %2206 = vrcp.f32 %v1195_v57  ;;  %v1166_v6 = vpop.f32.mrf.mxu2  ;;  %v1179_v30 = vpop.f32.mrf.mxu3  ;;  %v1223_v34 = vand.u32 2147483648, %v1195_v57  ;;  %v1221_v55 = vand.u32 2147483647, %v1195_v57  ;;  %vm1217_vm3 = vweird.f32 %v1195_v57 }
 0x3a0   :  { %v1209_v27 = vor.u32 1.1754944e-38, %v1208_v42  ;;  %vm1207_vm6 = vcmp.eq.f32.partialorder %v1206_v17, 8.507059e+37 }
 0x3a1   :  { %v1224_v52 = vor.u32 1.1754944e-38, %v1223_v34  ;;  %vm1222_vm7 = vcmp.eq.f32.partialorder %v1221_v55, 8.507059e+37 }
 0x3a2   :  { %v2203_v16 = vpop.eup %2202 }
 0x3a3   :  { %v1196_v54 = vadd.f32 1.0, %v2203_v16 }
 0x3a4   :  { %v2205_v19 = vpop.eup %2204 }
 0x3a5   :  { %v2207_v29 = vpop.eup %2206  ;;  %v1198_v25 = vmul.f32 %v2205_v19, %v1194_v0  ;;  %2208 = vrcp.f32 %v1196_v54  ;;  %vm1203_vm0 = vweird.f32 %v2205_v19  ;;  %vm1232_vm9 = vweird.f32 %v1196_v54 }
 0x3a6   :  { %v1213_v5 = vmul.f32 %v2207_v29, %v1195_v57  ;;  %2210 = vtanh.f32 %v1184_v31  ;;  %vm1218_vm1 = vweird.f32 %v2207_v29  ;;  %vm1204_vm4 = vmor %vm1202_vm2, %vm1203_vm0  ;;  %v1238_v31 = vand.u32 2147483648, %v1196_v54 }
 0x3a7   :  { %v1199_v40 = vsub.f32 1.0, %v1198_v25  ;;  %vm1219_vm5 = vmor %vm1217_vm3, %vm1218_vm1 }
 0x3a8   :  { %v1214_v12 = vsub.f32 1.0, %v1213_v5  ;;  %v1239_v5 = vor.u32 1.1754944e-38, %v1238_v31 }
 0x3a9   :  { %v1200_v23 = vmul.f32 %v2205_v19, %v1199_v40 }
 0x3aa   :  { %v1215_v61 = vmul.f32 %v2207_v29, %v1214_v12 }
 0x3ab   :  { %v2209_v35 = vpop.eup %2208  ;;  %v1201_v28 = vadd.f32 %v2205_v19, %v1200_v23 }
 0x3ac   :  { %v1228_v46 = vmul.f32 %v2209_v35, %v1196_v54  ;;  %v1216_v58 = vadd.f32 %v2207_v29, %v1215_v61  ;;  %v2211_v2 = vpop.eup %2210  ;;  %vm1233_vm8 = vweird.f32 %v2209_v35 }
 0x3ad   :  { %v1205_v18 = vsel %vm1204_vm4, %v2205_v19, %v1201_v28  ;;  %v1236_v19 = vand.u32 2147483647, %v1196_v54  ;;  %vm1234_vm10 = vmor %vm1232_vm9, %vm1233_vm8 }
 0x3ae   :  { %v1229_v43 = vsub.f32 1.0, %v1228_v46  ;;  %v1210_v22 = vsel %vm1207_vm6, %v1209_v27, %v1205_v18  ;;  %v1220_v49 = vsel %vm1219_vm5, %v2207_v29, %v1216_v58 }
 0x3af   :  { %v1225_v6 = vsel %vm1222_vm7, %v1224_v52, %v1220_v49  ;;  %v1244_v30 = vmul.f32 %v2211_v2, %v1210_v22  ;;  %vm1237_vm11 = vcmp.eq.f32.partialorder %v1236_v19, 8.507059e+37 }
 0x3b0   :  { %v1243_v16 = vmul.f32 %v1225_v6, %v3084_v10  ;;  %v1230_v45 = vmul.f32 %v2209_v35, %v1229_v43 }
 0x3b2   :  { %v3124_v0 = vadd.f32 %v1244_v30, %v1243_v16  ;;  %v1231_v57 = vadd.f32 %v2209_v35, %v1230_v45 }
 0x3b4   :  { %2212 = vtanh.f32 %v3124_v0  ;;  %v1235_v25 = vsel %vm1234_vm10, %v2209_v35, %v1231_v57 }
 0x3b5   :  { %v1240_v40 = vsel %vm1237_vm11, %v1239_v5, %v1235_v25 }
 0x3ba   :  { %v2213_v29 = vpop.eup %2212 }
 0x3bb   :  { %v1247_v12 = vmul.f32 %v2213_v29, %v1240_v40 }
 0x3bd   :  { %v1255_v42 = vpack.c.bf16 %v1247_v12, %v1247_v12 }
 0x3bf   :  { %1264 = vmatmul.bf16.vlgmr.msra.gmra.mxu0 %v1255_v42  ;;  %1277 = vmatmul.bf16.vlgmr.msra.gmra.mxu1 %v1255_v42 }
 0x3c0   :  { %1290 = vmatmul.bf16.vlgmr.msra.gmra.mxu2 %v1255_v42  ;;  %1303 = vmatmul.bf16.vlgmr.msra.gmra.mxu3 %v1255_v42 }
 0x3c1   :  { %1510 = vmatpush.bf16.msra.mxu0 %v2514_v37  ;;  %1523 = vmatpush.bf16.msra.mxu1 %v2525_v41 }
 0x3c2   :  { %1536 = vmatpush.bf16.msra.mxu2 %v2542_v47  ;;  %1549 = vmatpush.bf16.msra.mxu3 %v2553_v51  ;;  %v3251_v47 = vld [vmem:[#allocation15_spill] sm:$0xff]  ;;  %v3252_v51 = vld [vmem:[#allocation16_spill] sm:$0xff] }
 0x3c5   :  { %1511 = vmatpush.bf16.msra.mxu0 %v2545_v48  ;;  %1524 = vmatpush.bf16.msra.mxu1 %v2559_v53 }
 0x3c6   :  { %1537 = vmatpush.bf16.msra.mxu2 %v2577_v59  ;;  %1550 = vmatpush.bf16.msra.mxu3 %v2589_v63 }
 0x3c9   :  { %1512 = vmatpush.bf16.msra.mxu0 %v2581_v60  ;;  %1525 = vmatpush.bf16.msra.mxu1 %v2595_v1 }
 0x3ca   :  { %1538 = vmatpush.bf16.msra.mxu2 %v2613_v7  ;;  %1551 = vmatpush.bf16.msra.mxu3 %v2625_v11  ;;  %v3253_v7 = vld [vmem:[#allocation17_spill] sm:$0xff] }
 0x3cd   :  { %1513 = vmatpush.bf16.msra.mxu0 %v2617_v8  ;;  %1526 = vmatpush.bf16.msra.mxu1 %v2631_v13 }
 0x3ce   :  { %1539 = vmatpush.bf16.msra.mxu2 %v2652_v20  ;;  %1552 = vmatpush.bf16.msra.mxu3 %v2664_v24 }
 0x3d1   :  { %1514 = vmatpush.bf16.msra.mxu0 %v2656_v21  ;;  %1527 = vmatpush.bf16.msra.mxu1 %v2670_v26 }
 0x3d2   :  { %1540 = vmatpush.bf16.msra.mxu2 %v2688_v32  ;;  %1553 = vmatpush.bf16.msra.mxu3 %v2700_v36 }
 0x3d5   :  { %1515 = vmatpush.bf16.msra.mxu0 %v2692_v33  ;;  %1528 = vmatpush.bf16.msra.mxu1 %v2703_v38 }
 0x3d6   :  { %1541 = vmatpush.bf16.msra.mxu2 %v2706_v39  ;;  %1554 = vmatpush.bf16.msra.mxu3 %v2742_v56 }
 0x3d9   :  { %1516 = vmatpush.bf16.msra.mxu0 %v2719_v44  ;;  %1529 = vmatpush.bf16.msra.mxu1 %v2731_v50  ;;  %v3254_v50 = vld [vmem:[#allocation18_spill] sm:$0xff] }
 0x3da   :  { %1542 = vmatpush.bf16.msra.mxu2 %v2754_v62  ;;  %1555 = vmatpush.bf16.msra.mxu3 %v2766_v4 }
 0x3dd   :  { %1517 = vmatpush.bf16.msra.mxu0 %v2764_v3  ;;  %1530 = vmatpush.bf16.msra.mxu1 %v2775_v9 }
 0x3de   :  { %1543 = vmatpush.bf16.msra.mxu2 %v2784_v14  ;;  %1556 = vmatpush.bf16.msra.mxu3 %v2788_v15 }
 0x43c   :  { %v1265_v37 = vpop.f32.mrf.mxu0  ;;  %v1278_v41 = vpop.f32.mrf.mxu1 }
 0x43d   :  { %v1308_v48 = vadd.f32 %v1265_v37, %v3251_v47  ;;  %v1309_v53 = vadd.f32 %v1278_v41, %v3252_v51  ;;  %v3255_v37 = vld [vmem:[#allocation19_spill] sm:$0xff]  ;;  %v3256_v47 = vld [vmem:[#allocation20_spill] sm:$0xff] }
 0x43f   :  { %v2016_v59 = vmul.f32 -1.442695, %v1308_v48  ;;  %v2017_v60 = vmul.f32 -1.442695, %v1309_v53 }
 0x441   :  { %2214 = vpow2.f32 %v2016_v59 }
 0x442   :  { %2216 = vpow2.f32 %v2017_v60 }
 0x443   :  { %v1291_v63 = vpop.f32.mrf.mxu2  ;;  %v1304_v1 = vpop.f32.mrf.mxu3 }
 0x444   :  { %v1310_v8 = vadd.f32 %v1291_v63, %v3253_v7  ;;  %v1267_v11 = vpop.f32.mrf.mxu0  ;;  %v1280_v13 = vpop.f32.mrf.mxu1  ;;  %v1311_v56 = vadd.f32 %v1304_v1, %v3254_v50  ;;  %v3257_v63 = vld [vmem:[#allocation21_spill] sm:$0xff] }
 0x446   :  { %v2018_v20 = vmul.f32 -1.442695, %v1310_v8 }
 0x447   :  { %v2215_v21 = vpop.eup %2214 }
 0x448   :  { %v2217_v24 = vpop.eup %2216  ;;  %v1321_v26 = vadd.f32 1.0, %v2215_v21  ;;  %2218 = vpow2.f32 %v2018_v20 }
 0x449   :  { %v1322_v32 = vadd.f32 1.0, %v2217_v24 }
 0x44a   :  { %2220 = vrcp.f32 %v1321_v26  ;;  %v1335_v15 = vand.u32 2147483648, %v1321_v26  ;;  %v1333_v34 = vand.u32 2147483647, %v1321_v26  ;;  %vm1329_vm14 = vweird.f32 %v1321_v26 }
 0x44b   :  { %2222 = vrcp.f32 %v1322_v32  ;;  %v1293_v33 = vpop.f32.mrf.mxu2  ;;  %v1306_v36 = vpop.f32.mrf.mxu3  ;;  %v1350_v10 = vand.u32 2147483648, %v1322_v32  ;;  %v1348_v17 = vand.u32 2147483647, %v1322_v32  ;;  %vm1344_vm15 = vweird.f32 %v1322_v32 }
 0x44c   :  { %v1336_v28 = vor.u32 1.1754944e-38, %v1335_v15  ;;  %vm1334_vm2 = vcmp.eq.f32.partialorder %v1333_v34, 8.507059e+37 }
 0x44d   :  { %v1351_v27 = vor.u32 1.1754944e-38, %v1350_v10  ;;  %vm1349_vm3 = vcmp.eq.f32.partialorder %v1348_v17, 8.507059e+37 }
 0x44e   :  { %v2219_v38 = vpop.eup %2218 }
 0x44f   :  { %v1323_v39 = vadd.f32 1.0, %v2219_v38 }
 0x450   :  { %v2221_v44 = vpop.eup %2220 }
 0x451   :  { %v2223_v62 = vpop.eup %2222  ;;  %v1325_v3 = vmul.f32 %v2221_v44, %v1321_v26  ;;  %2224 = vrcp.f32 %v1323_v39  ;;  %vm1330_vm12 = vweird.f32 %v2221_v44  ;;  %v1365_v57 = vand.u32 2147483648, %v1323_v39 }
 0x452   :  { %v1340_v4 = vmul.f32 %v2223_v62, %v1322_v32  ;;  %2226 = vtanh.f32 %v1311_v56  ;;  %vm1345_vm13 = vweird.f32 %v2223_v62  ;;  %vm1331_vm0 = vmor %vm1329_vm14, %vm1330_vm12  ;;  %vm1359_vm5 = vweird.f32 %v1323_v39 }
 0x453   :  { %v1326_v9 = vsub.f32 1.0, %v1325_v3  ;;  %vm1346_vm1 = vmor %vm1344_vm15, %vm1345_vm13  ;;  %v1363_v31 = vand.u32 2147483647, %v1323_v39  ;;  %v1366_v25 = vor.u32 1.1754944e-38, %v1365_v57 }
 0x454   :  { %v1341_v14 = vsub.f32 1.0, %v1340_v4 }
 0x455   :  { %v1327_v54 = vmul.f32 %v2221_v44, %v1326_v9  ;;  %vm1364_vm7 = vcmp.eq.f32.partialorder %v1363_v31, 8.507059e+37 }
 0x456   :  { %v1342_v23 = vmul.f32 %v2223_v62, %v1341_v14 }
 0x457   :  { %v2225_v61 = vpop.eup %2224  ;;  %v1328_v55 = vadd.f32 %v2221_v44, %v1327_v54 }
 0x458   :  { %v1355_v35 = vmul.f32 %v2225_v61, %v1323_v39  ;;  %v1343_v46 = vadd.f32 %v2223_v62, %v1342_v23  ;;  %v2227_v52 = vpop.eup %2226  ;;  %vm1360_vm4 = vweird.f32 %v2225_v61  ;;  %v3258_v39 = vld [vmem:[#allocation22_spill] sm:$0xff] }
 0x459   :  { %v1332_v58 = vsel %vm1331_vm0, %v2221_v44, %v1328_v55  ;;  %vm1361_vm6 = vmor %vm1359_vm5, %vm1360_vm4 }
 0x45a   :  { %v1356_v18 = vsub.f32 1.0, %v1355_v35  ;;  %v1337_v2 = vsel %vm1334_vm2, %v1336_v28, %v1332_v58  ;;  %v1347_v43 = vsel %vm1346_vm1, %v2223_v62, %v1343_v46 }
 0x45b   :  { %v1352_v22 = vsel %vm1349_vm3, %v1351_v27, %v1347_v43  ;;  %v1371_v49 = vmul.f32 %v2227_v52, %v1337_v2 }
 0x45c   :  { %v1370_v6 = vmul.f32 %v1352_v22, %v3124_v0  ;;  %v1357_v30 = vmul.f32 %v2225_v61, %v1356_v18 }
 0x45e   :  { %v3164_v16 = vadd.f32 %v1371_v49, %v1370_v6  ;;  %v1358_v45 = vadd.f32 %v2225_v61, %v1357_v30 }
 0x460   :  { %2228 = vtanh.f32 %v3164_v16  ;;  %v1362_v19 = vsel %vm1361_vm6, %v2225_v61, %v1358_v45 }
 0x461   :  { %v1367_v29 = vsel %vm1364_vm7, %v1366_v25, %v1362_v19 }
 0x466   :  { %v2229_v5 = vpop.eup %2228 }
 0x467   :  { %v1374_v40 = vmul.f32 %v2229_v5, %v1367_v29 }
 0x469   :  { %v1382_v12 = vpack.c.bf16 %v1374_v40, %v1374_v40 }
 0x46b   :  { %1391 = vmatmul.bf16.vlgmr.msrb.gmra.mxu0 %v1382_v12  ;;  %1404 = vmatmul.bf16.vlgmr.msrb.gmra.mxu1 %v1382_v12 }
 0x46c   :  { %1417 = vmatmul.bf16.vlgmr.msrb.gmra.mxu2 %v1382_v12  ;;  %1430 = vmatmul.bf16.vlgmr.msrb.gmra.mxu3 %v1382_v12  ;;  %v2131_v12 = vld [vmem:[%s3217_s6 + $0x30] sm:$0xff] }
 0x4e8   :  { %v1392_v0 = vpop.f32.mrf.mxu0  ;;  %v1405_v42 = vpop.f32.mrf.mxu1 }
 0x4e9   :  { %v1435_v41 = vadd.f32 %v1392_v0, %v3255_v37  ;;  %v1436_v48 = vadd.f32 %v1405_v42, %v3256_v47  ;;  %v2130_v0 = vld [vmem:[%s3217_s6 + $0x28] sm:$0xff]  ;;  %v2129_v42 = vld [vmem:[%s3217_s6 + $0x20] sm:$0xff]  ;;  %v2128_v37 = vld [vmem:[%s3217_s6 + $0x18] sm:$0xff] }
 0x4eb   :  { %v2019_v51 = vmul.f32 -1.442695, %v1435_v41  ;;  %v2020_v53 = vmul.f32 -1.442695, %v1436_v48  ;;  %v3259_v48 = vld [vmem:[#allocation23_spill] sm:$0xff] }
 0x4ed   :  { %2230 = vpow2.f32 %v2019_v51 }
 0x4ee   :  { %2232 = vpow2.f32 %v2020_v53  ;;  %v3260_v53 = vld [vmem:[#allocation24_spill] sm:$0xff] }
 0x4ef   :  { %v1418_v59 = vpop.f32.mrf.mxu2  ;;  %v1431_v60 = vpop.f32.mrf.mxu3 }
 0x4f0   :  { %v1437_v1 = vadd.f32 %v1418_v59, %v3257_v63  ;;  %v1394_v7 = vpop.f32.mrf.mxu0  ;;  %v1407_v8 = vpop.f32.mrf.mxu1  ;;  %v1438_v44 = vadd.f32 %v1431_v60, %v3258_v39 }
 0x4f1   :  { %v2126_v7 = vld [vmem:[%s3217_s6 + $0x8] sm:$0xff] }
 0x4f2   :  { %v2021_v11 = vmul.f32 -1.442695, %v1437_v1  ;;  %v2127_v1 = vld [vmem:[%s3217_s6 + $0x10] sm:$0xff] }
 0x4f3   :  { %v2231_v13 = vpop.eup %2230 }
 0x4f4   :  { %v2233_v20 = vpop.eup %2232  ;;  %v1448_v21 = vadd.f32 1.0, %v2231_v13  ;;  %2234 = vpow2.f32 %v2021_v11  ;;  %v3261_v13 = vld [vmem:[#allocation25_spill] sm:$0xff] }
 0x4f5   :  { %v1449_v24 = vadd.f32 1.0, %v2233_v20 }
 0x4f6   :  { %2236 = vrcp.f32 %v1448_v21  ;;  %v1462_v9 = vand.u32 2147483648, %v1448_v21  ;;  %v1460_v10 = vand.u32 2147483647, %v1448_v21  ;;  %vm1456_vm10 = vweird.f32 %v1448_v21 }
 0x4f7   :  { %2238 = vrcp.f32 %v1449_v24  ;;  %v1420_v26 = vpop.f32.mrf.mxu2  ;;  %v1433_v32 = vpop.f32.mrf.mxu3  ;;  %v1477_v14 = vand.u32 2147483648, %v1449_v24  ;;  %v1475_v34 = vand.u32 2147483647, %v1449_v24  ;;  %vm1471_vm11 = vweird.f32 %v1449_v24 }
 0x4f8   :  { %v1463_v55 = vor.u32 1.1754944e-38, %v1462_v9  ;;  %vm1461_vm14 = vcmp.eq.f32.partialorder %v1460_v10, 8.507059e+37  ;;  %v2125_v26 = vld [vmem:[%s3217_s6] sm:$0xff] }
 0x4f9   :  { %v1478_v28 = vor.u32 1.1754944e-38, %v1477_v14  ;;  %vm1476_vm15 = vcmp.eq.f32.partialorder %v1475_v34, 8.507059e+37 }
 0x4fa   :  { %v2235_v33 = vpop.eup %2234 }
 0x4fb   :  { %v1450_v36 = vadd.f32 1.0, %v2235_v33 }
 0x4fc   :  { %v2237_v38 = vpop.eup %2236 }
 0x4fd   :  { %v2239_v50 = vpop.eup %2238  ;;  %v1452_v56 = vmul.f32 %v2237_v38, %v1448_v21  ;;  %2240 = vrcp.f32 %v1450_v36  ;;  %vm1457_vm8 = vweird.f32 %v2237_v38  ;;  %v1492_v45 = vand.u32 2147483648, %v1450_v36 }
 0x4fe   :  { %v1467_v62 = vmul.f32 %v2239_v50, %v1449_v24  ;;  %2242 = vtanh.f32 %v1438_v44  ;;  %vm1472_vm9 = vweird.f32 %v2239_v50  ;;  %vm1458_vm12 = vmor %vm1456_vm10, %vm1457_vm8  ;;  %vm1486_vm1 = vweird.f32 %v1450_v36 }
 0x4ff   :  { %v1453_v3 = vsub.f32 1.0, %v1452_v56  ;;  %vm1473_vm13 = vmor %vm1471_vm11, %vm1472_vm9  ;;  %v1490_v57 = vand.u32 2147483647, %v1450_v36  ;;  %v1493_v19 = vor.u32 1.1754944e-38, %v1492_v45 }
 0x500   :  { %v1468_v4 = vsub.f32 1.0, %v1467_v62 }
 0x501   :  { %v1454_v15 = vmul.f32 %v2237_v38, %v1453_v3  ;;  %vm1491_vm3 = vcmp.eq.f32.partialorder %v1490_v57, 8.507059e+37 }
 0x502   :  { %v1469_v54 = vmul.f32 %v2239_v50, %v1468_v4  ;;  %v3262_v4 = vld [vmem:[#allocation26_spill] sm:$0xff] }
 0x503   :  { %v2241_v23 = vpop.eup %2240  ;;  %v1455_v17 = vadd.f32 %v2237_v38, %v1454_v15 }
 0x504   :  { %v1482_v61 = vmul.f32 %v2241_v23, %v1450_v36  ;;  %v1470_v35 = vadd.f32 %v2239_v50, %v1469_v54  ;;  %v2243_v27 = vpop.eup %2242  ;;  %vm1487_vm0 = vweird.f32 %v2241_v23 }
 0x505   :  { %v1459_v46 = vsel %vm1458_vm12, %v2237_v38, %v1455_v17  ;;  %vm1488_vm2 = vmor %vm1486_vm1, %vm1487_vm0 }
 0x506   :  { %v1483_v58 = vsub.f32 1.0, %v1482_v61  ;;  %v1464_v52 = vsel %vm1461_vm14, %v1463_v55, %v1459_v46  ;;  %v1474_v18 = vsel %vm1473_vm13, %v2239_v50, %v1470_v35 }
 0x507   :  { %v1479_v2 = vsel %vm1476_vm15, %v1478_v28, %v1474_v18  ;;  %v1498_v43 = vmul.f32 %v2243_v27, %v1464_v52 }
 0x508   :  { %v1497_v22 = vmul.f32 %v1479_v2, %v3164_v16  ;;  %v1484_v49 = vmul.f32 %v2241_v23, %v1483_v58  ;;  %v2132_v16 = vld [vmem:[%s3217_s6 + $0x38] sm:$0xff] }
 0x509   :  { %1703 = vmatpush.bf16.msrb.mxu0 %v2132_v16 }
 0x50a   :  { %v3172_v6 = vadd.f32 %v1498_v43, %v1497_v22  ;;  %v1485_v30 = vadd.f32 %v2241_v23, %v1484_v49 }
 0x50c   :  { %2244 = vtanh.f32 %v3172_v6  ;;  %v1489_v31 = vsel %vm1488_vm2, %v2241_v23, %v1485_v30 }
 0x50d   :  { %v1494_v5 = vsel %vm1491_vm3, %v1493_v19, %v1489_v31  ;;  %1704 = vmatpush.bf16.msrb.mxu0 %v2131_v12 }
 0x511   :  { %1705 = vmatpush.bf16.msrb.mxu0 %v2130_v0 }
 0x512   :  { %v2245_v25 = vpop.eup %2244 }
 0x513   :  { %v1501_v29 = vmul.f32 %v2245_v25, %v1494_v5 }
 0x515   :  { %v1509_v40 = vpack.c.bf16 %v1501_v29, %v1501_v29  ;;  %1706 = vmatpush.bf16.msrb.mxu0 %v2129_v42 }
 0x517   :  { %1518 = vmatmul.bf16.vlgmr.msra.gmra.mxu0 %v1509_v40  ;;  %1531 = vmatmul.bf16.vlgmr.msra.gmra.mxu1 %v1509_v40 }
 0x518   :  { %1544 = vmatmul.bf16.vlgmr.msra.gmra.mxu2 %v1509_v40  ;;  %1557 = vmatmul.bf16.vlgmr.msra.gmra.mxu3 %v1509_v40 }
 0x519   :  { %1707 = vmatpush.bf16.msrb.mxu0 %v2128_v37 }
 0x51d   :  { %1708 = vmatpush.bf16.msrb.mxu0 %v2127_v1 }
 0x521   :  { %1709 = vmatpush.bf16.msrb.mxu0 %v2126_v7 }
 0x525   :  { %1710 = vmatpush.bf16.msrb.mxu0 %v2125_v26 }
 0x594   :  { %v1519_v41 = vpop.f32.mrf.mxu0  ;;  %v1532_v47 = vpop.f32.mrf.mxu1 }
 0x595   :  { %v1562_v51 = vadd.f32 %v1519_v41, %v3259_v48  ;;  %v1563_v59 = vadd.f32 %v1532_v47, %v3260_v53 }
 0x597   :  { %v2022_v60 = vmul.f32 -1.442695, %v1562_v51  ;;  %v2023_v63 = vmul.f32 -1.442695, %v1563_v59 }
 0x599   :  { %2246 = vpow2.f32 %v2022_v60 }
 0x59a   :  { %2248 = vpow2.f32 %v2023_v63 }
 0x59b   :  { %v1545_v8 = vpop.f32.mrf.mxu2  ;;  %v1558_v11 = vpop.f32.mrf.mxu3 }
 0x59c   :  { %v1564_v20 = vadd.f32 %v1545_v8, %v3261_v13  ;;  %v1521_v21 = vpop.f32.mrf.mxu0  ;;  %v1534_v24 = vpop.f32.mrf.mxu1  ;;  %v1565_v9 = vadd.f32 %v1558_v11, %v3262_v4 }
 0x59e   :  { %v2024_v32 = vmul.f32 -1.442695, %v1564_v20 }
 0x59f   :  { %v2247_v33 = vpop.eup %2246 }
 0x5a0   :  { %v2249_v36 = vpop.eup %2248  ;;  %v1575_v38 = vadd.f32 1.0, %v2247_v33  ;;  %2250 = vpow2.f32 %v2024_v32 }
 0x5a1   :  { %v1576_v39 = vadd.f32 1.0, %v2249_v36 }
 0x5a2   :  { %2252 = vrcp.f32 %v1575_v38  ;;  %v1589_v23 = vand.u32 2147483648, %v1575_v38  ;;  %v1587_v55 = vand.u32 2147483647, %v1575_v38  ;;  %vm1583_vm6 = vweird.f32 %v1575_v38 }
 0x5a3   :  { %2254 = vrcp.f32 %v1576_v39  ;;  %v1547_v44 = vpop.f32.mrf.mxu2  ;;  %v1560_v50 = vpop.f32.mrf.mxu3  ;;  %v1604_v17 = vand.u32 2147483648, %v1576_v39  ;;  %v1602_v28 = vand.u32 2147483647, %v1576_v39  ;;  %vm1598_vm7 = vweird.f32 %v1576_v39 }
 0x5a4   :  { %v1590_v52 = vor.u32 1.1754944e-38, %v1589_v23  ;;  %vm1588_vm10 = vcmp.eq.f32.partialorder %v1587_v55, 8.507059e+37 }
 0x5a5   :  { %v1605_v2 = vor.u32 1.1754944e-38, %v1604_v17  ;;  %vm1603_vm11 = vcmp.eq.f32.partialorder %v1602_v28, 8.507059e+37 }
 0x5a6   :  { %v2251_v56 = vpop.eup %2250 }
 0x5a7   :  { %v1577_v62 = vadd.f32 1.0, %v2251_v56 }
 0x5a8   :  { %v2253_v3 = vpop.eup %2252 }
 0x5a9   :  { %v2255_v14 = vpop.eup %2254  ;;  %v1579_v15 = vmul.f32 %v2253_v3, %v1575_v38  ;;  %2256 = vrcp.f32 %v1577_v62  ;;  %vm1584_vm4 = vweird.f32 %v2253_v3  ;;  %v1619_v40 = vand.u32 2147483648, %v1577_v62 }
 0x5aa   :  { %v1594_v10 = vmul.f32 %v2255_v14, %v1576_v39  ;;  %2258 = vtanh.f32 %v1565_v9  ;;  %vm1599_vm5 = vweird.f32 %v2255_v14  ;;  %vm1585_vm8 = vmor %vm1583_vm6, %vm1584_vm4  ;;  %vm1613_vm13 = vweird.f32 %v1577_v62 }
 0x5ab   :  { %v1580_v54 = vsub.f32 1.0, %v1579_v15  ;;  %vm1600_vm9 = vmor %vm1598_vm7, %vm1599_vm5  ;;  %v1617_v16 = vand.u32 2147483647, %v1577_v62  ;;  %v1620_v0 = vor.u32 1.1754944e-38, %v1619_v40 }
 0x5ac   :  { %v1595_v34 = vsub.f32 1.0, %v1594_v10 }
 0x5ad   :  { %v1581_v61 = vmul.f32 %v2253_v3, %v1580_v54  ;;  %vm1618_vm15 = vcmp.eq.f32.partialorder %v1617_v16, 8.507059e+37 }
 0x5ae   :  { %v1596_v35 = vmul.f32 %v2255_v14, %v1595_v34 }
 0x5af   :  { %v2257_v46 = vpop.eup %2256  ;;  %v1582_v27 = vadd.f32 %v2253_v3, %v1581_v61 }
 0x5b0   :  { %v1609_v58 = vmul.f32 %v2257_v46, %v1577_v62  ;;  %v1597_v18 = vadd.f32 %v2255_v14, %v1596_v35  ;;  %v2259_v22 = vpop.eup %2258  ;;  %vm1614_vm12 = vweird.f32 %v2257_v46 }
 0x5b1   :  { %v1586_v43 = vsel %vm1585_vm8, %v2253_v3, %v1582_v27  ;;  %vm1615_vm14 = vmor %vm1613_vm13, %vm1614_vm12 }
 0x5b2   :  { %v1610_v49 = vsub.f32 1.0, %v1609_v58  ;;  %v1591_v30 = vsel %vm1588_vm10, %v1590_v52, %v1586_v43  ;;  %v1601_v45 = vsel %vm1600_vm9, %v2255_v14, %v1597_v18 }
 0x5b3   :  { %v1606_v57 = vsel %vm1603_vm11, %v1605_v2, %v1601_v45  ;;  %v1625_v31 = vmul.f32 %v2259_v22, %v1591_v30 }
 0x5b4   :  { %v1611_v19 = vmul.f32 %v2257_v46, %v1610_v49  ;;  %v1624_v25 = vmul.f32 %v1606_v57, %v3172_v6  ;;  %v2133_v6 = vld [vmem:[%s3216_s7] ss:$0 sm:$0xff] }
 0x5b6   :  { %v1626_v5 = vadd.f32 %v1625_v31, %v1624_v25  ;;  %v1612_v29 = vadd.f32 %v2257_v46, %v1611_v19 }
 0x5b8   :  { %2260 = vtanh.f32 %v1626_v5  ;;  %v1616_v12 = vsel %vm1615_vm14, %v2257_v46, %v1612_v29 }
 0x5b9   :  { %v1621_v37 = vsel %vm1618_vm15, %v1620_v0, %v1616_v12 }
 0x5be   :  { %v2261_v42 = vpop.eup %2260 }
 0x5bf   :  { %v1628_v41 = vmul.f32 %v2261_v42, %v1621_v37 }
 0x5c1   :  { %v1634_v47 = vpack.c.bf16 %v1628_v41, %v1628_v41 }
 0x5c3   :  { %1711 = vmatmul.bf16.vlgmr.msrb.gmra.mxu0 %v1634_v47 }
 0x640   :  { %v1712_v48 = vpop.f32.mrf.mxu0 }
 0x641   :  { %v1713_v51 = vadd.f32 %v2133_v6, %v1712_v48 }
 0x643   :  { %v1716_v53 = vmax.f32 %v1713_v51, 0.0 }
 0x645   :  { %1717 = vst [vmem:[%s3218_s8] sm:$0xff] %v1716_v53 }
 0x648   :  { %v1714_v59 = vpop.f32.mrf.mxu0 }

</bundles_post_ra>
